<compile_context>
chip_gen: v7x
topology: tpu7x:2x2x1
jax: 0.10.0
libtpu: 0.0.40
codegen_flags: <defaults>
</compile_context>

<pallas_src>
import numpy as np
import jax
import jax.numpy as jnp
from jax import lax
from jax.experimental import pallas as pl
from jax.experimental.pallas import tpu as pltpu

B = 2
C_IN, L_IN = 20, 198
C1 = 32            # conv1 / conv3 output channels
C2 = 20            # conv2 output channels
K = 5
L1 = 196           # conv1 output length
LP = 98            # after MaxPool1d(2)
LPE = 104          # pooled length + 2-row front halo + 4-row back pad (multiple of 8)
L2 = 96            # conv2 output length
L2E = 98           # conv2 output with a 1-row halo on each side (== conv3 padded input)
L3 = 94            # conv3 output length
NUM_CLASSES = 4


def cnn_bcs_kernel(c_ref, w1_ref, w2_ref, w3_ref, wfc_ref, const_ref, out_ref):
    """One batch element per grid step; all activations stay in vregs (no VMEM scratch)."""
    consts = const_ref[...]                       # (8, 128) packed constants slab
    a1 = consts[0:1, 0:C1]                        # bn1 scale
    c1 = consts[1:2, 0:C1]                        # bn1 shift (conv1 bias folded in)
    b2 = consts[2:3, 0:C2]                        # conv2 bias
    a3 = consts[3:4, :]                           # bn3 scale, tiled x4 along lanes (1, 128)
    c3 = consts[4:5, :]                           # bn3 shift (conv3 bias folded in), tiled x4
    bfc = consts[5:6, 0:NUM_CLASSES]              # fc bias

    # ---- conv1 (im2col) + bn1 + relu1: one (208,100)x(100,32) MXU matmul over stacked slabs ----
    y1 = jnp.dot(c_ref[0], w1_ref[...], preferred_element_type=jnp.float32)   # (208, 32)
    h1 = jnp.maximum(y1 * a1 + c1, 0.0)

    # ---- MaxPool1d(2): elementwise max of even/odd phases; iota mask re-creates conv2 padding ----
    he = h1[0:LPE, :]                             # sublane-aligned static slices (104 % 8 == 0)
    ho = h1[LPE:2 * LPE, :]
    rows1 = lax.broadcasted_iota(jnp.int32, (LPE, 1), 0)
    x2 = jnp.where((rows1 >= 2) & (rows1 < 2 + LP), jnp.maximum(he, ho), 0.0)  # (104, 32) f32

    # ---- conv2 (k=5, p=1) + relu2: 5 shifted MXU taps (each operand cast to bf16 exactly once;
    #      f32 row slicing avoids bf16 sublane repacks at odd offsets) ----
    acc2 = jnp.dot(x2[0:L2E, :].astype(jnp.bfloat16), w2_ref[0],
                   preferred_element_type=jnp.float32)
    for k in range(1, K):
        acc2 = acc2 + jnp.dot(x2[k:k + L2E, :].astype(jnp.bfloat16), w2_ref[k],
                              preferred_element_type=jnp.float32)
    rows2 = lax.broadcasted_iota(jnp.int32, (L2E, 1), 0)
    # mask re-creates conv3's zero padding (rows 0 and 97 are the padding rows)
    x3 = jnp.where((rows2 >= 1) & (rows2 < 1 + L2),
                   jnp.maximum(acc2 + b2, 0.0), 0.0)                           # (98, 20) f32

    # ---- conv3 (k=5, p=1) + bn3 + relu3 as a single K=100 matmul (lane-concatenated im2col);
    #      weights are pre-tiled x4 along lanes so h3 is lane-dense (94, 128) ----
    x3_cat = jnp.concatenate([x3[k:k + L3, :] for k in range(K)], axis=1)      # (94, 100) f32
    acc3 = jnp.dot(x3_cat.astype(jnp.bfloat16), w3_ref[...],
                   preferred_element_type=jnp.float32)                         # (94, 128) f32
    h3 = jnp.maximum(acc3 * a3 + c3, 0.0)

    # ---- fc1, lane-dense and exact-f32: VPU product, XLU row reduce, per-class lane-group sums ----
    colsum = jnp.sum(h3 * wfc_ref[...], axis=0, keepdims=True)                 # (1, 128)
    logits = jnp.concatenate(
        [jnp.sum(colsum[:, n * C1:(n + 1) * C1], axis=1, keepdims=True)
         for n in range(NUM_CLASSES)], axis=1) + bfc                           # (1, 4)
    out_ref[0] = logits


def prepare_params(params):
    """One-time parameter preprocessing (hoisted out of the per-call jitted path)."""
    (w1, b1, g1, be1, m1, v1, w2, b2, w3, b3, g3, be3, m3, v3, wfc, bfc) = params
    eps = 1e-5
    sc1 = g1 / jnp.sqrt(v1 + eps)
    sc3 = g3 / jnp.sqrt(v3 + eps)
    a1 = sc1
    c1 = (b1 - m1) * sc1 + be1                    # conv1 bias folded into bn1 shift
    a3 = sc3
    c3 = (b3 - m3) * sc3 + be3                    # conv3 bias folded into bn3 shift

    # conv1 im2col weight: w1f[k*20 + c, o] = w1[o, c, k]
    w1f = jnp.transpose(w1, (2, 1, 0)).reshape(K * C_IN, C1).astype(jnp.bfloat16)        # (100, 32)
    # conv2 per-tap weights: w2k[k, ci, co] = w2[co, ci, k]
    w2k = jnp.transpose(w2, (2, 1, 0)).astype(jnp.bfloat16)                              # (5, 32, 20)
    # conv3 weight, tiled x4 along lanes and flattened over (tap, in-channel): (100, 128)
    w3k = jnp.transpose(w3, (2, 1, 0))                                                   # (5, 20, 32)
    w3cat = jnp.tile(w3k, (1, 1, NUM_CLASSES)).reshape(K * C2,
                                                       NUM_CLASSES * C1).astype(jnp.bfloat16)
    # fc weight, lane-dense: wfc2d[l, n*32 + c] = wfc[n, c*94 + l]  (PyTorch view(-1, 32*94) order)
    wfc2d = jnp.transpose(wfc.reshape(NUM_CLASSES, C1, L3),
                          (2, 0, 1)).reshape(L3, NUM_CLASSES * C1).astype(jnp.float32)   # (94, 128)

    # Packed constants slab (one operand instead of six tiny ones).
    const = jnp.zeros((8, 128), jnp.float32)
    const = const.at[0, 0:C1].set(a1)
    const = const.at[1, 0:C1].set(c1)
    const = const.at[2, 0:C2].set(b2)
    const = const.at[3, :].set(jnp.tile(a3, (NUM_CLASSES,)))
    const = const.at[4, :].set(jnp.tile(c3, (NUM_CLASSES,)))
    const = const.at[5, 0:NUM_CLASSES].set(bfc)
    return w1f, w2k, w3cat, wfc2d, const


def cnn_bcs_forward(x_ncw, prepared):
    w1f, w2k, w3cat, wfc2d, const = prepared
    nb = x_ncw.shape[0]

    # Input-side im2col for conv1 (padding=1), split into even/odd pooling phases with a 2-row
    # zero halo (conv2's padding falls out of an in-kernel row mask) and padded to 104 rows so the
    # in-kernel even/odd split is sublane-aligned; both phases stacked into one LHS per element.
    x_blc = jnp.transpose(x_ncw, (0, 2, 1)).astype(jnp.float32)       # (B, 198, 20)
    x_pad = jnp.pad(x_blc, ((0, 0), (1, 1), (0, 0)))                  # (B, 200, 20)
    idx = np.arange(L1)[:, None] + np.arange(K)[None, :]              # (196, 5)
    cols = x_pad[:, idx, :].reshape(nb, L1, K * C_IN)                 # (B, 196, 100)
    cols_e = jnp.pad(cols[:, 0::2, :], ((0, 0), (2, LPE - LP - 2), (0, 0)))   # (B, 104, 100)
    cols_o = jnp.pad(cols[:, 1::2, :], ((0, 0), (2, LPE - LP - 2), (0, 0)))   # (B, 104, 100)
    cols_eo = jnp.concatenate([cols_e, cols_o], axis=1).astype(jnp.bfloat16)  # (B, 208, 100)

    def full2(shape):
        return pl.BlockSpec(shape, lambda b: (0, 0))

    out = pl.pallas_call(
        cnn_bcs_kernel,
        out_shape=jax.ShapeDtypeStruct((nb, 1, NUM_CLASSES), jnp.float32),
        grid=(nb,),
        in_specs=[
            pl.BlockSpec((1, 2 * LPE, K * C_IN), lambda b: (b, 0, 0)),   # stacked even/odd im2col
            full2((K * C_IN, C1)),                                       # w1f
            pl.BlockSpec((K, C1, C2), lambda b: (0, 0, 0)),              # w2k
            full2((K * C2, NUM_CLASSES * C1)),                           # w3cat
            full2((L3, NUM_CLASSES * C1)),                               # wfc2d
            full2((8, 128)),                                             # constants slab
        ],
        out_specs=pl.BlockSpec((1, 1, NUM_CLASSES), lambda b: (b, 0, 0)),
        compiler_params=pltpu.CompilerParams(dimension_semantics=("parallel",)),
    )(cols_eo, w1f, w2k, w3cat, wfc2d, const)
    return out[:, 0, :]


def ref_forward(x_ncw, params):
    """Pure-JAX reference reproducing the PyTorch (eval-mode) forward."""
    (w1, b1, g1, be1, m1, v1, w2, b2, w3, b3, g3, be3, m3, v3, wfc, bfc) = params
    eps = 1e-5
    dn = ('NCH', 'OIH', 'NCH')

    def conv(x, w, b):
        y = lax.conv_general_dilated(x, w, window_strides=(1,), padding=[(1, 1)],
                                     dimension_numbers=dn,
                                     precision=lax.Precision.HIGHEST)
        return y + b[None, :, None]

    def bn(x, g, be, m, v):
        return (x - m[None, :, None]) / jnp.sqrt(v[None, :, None] + eps) * g[None, :, None] \
            + be[None, :, None]

    y = jax.nn.relu(bn(conv(x_ncw, w1, b1), g1, be1, m1, v1))
    nb, c, l = y.shape
    y = y.reshape(nb, c, l // 2, 2).max(axis=-1)
    y = jax.nn.relu(conv(y, w2, b2))
    y = jax.nn.relu(bn(conv(y, w3, b3), g3, be3, m3, v3))
    flat = y.reshape(nb, -1)
    return jnp.dot(flat, wfc.T, precision=lax.Precision.HIGHEST) + bfc


if __name__ == "__main__":
    key = jax.random.PRNGKey(0)
    keys = jax.random.split(key, 20)

    def unif(k, shape, bound):
        return jax.random.uniform(k, shape, jnp.float32, -bound, bound)

    # Deterministic synthetic parameters (PyTorch layouts: conv (Cout, Cin, K), fc (out, in)).
    w1 = unif(keys[0], (32, 20, 5), 0.10); b1 = unif(keys[1], (32,), 0.10)
    g1 = 1.0 + unif(keys[2], (32,), 0.2); be1 = unif(keys[3], (32,), 0.1)
    m1 = unif(keys[4], (32,), 0.1);       v1 = 1.0 + unif(keys[5], (32,), 0.2)
    w2 = unif(keys[6], (20, 32, 5), 0.08); b2 = unif(keys[7], (20,), 0.08)
    w3 = unif(keys[8], (32, 20, 5), 0.10); b3 = unif(keys[9], (32,), 0.10)
    g3 = 1.0 + unif(keys[10], (32,), 0.2); be3 = unif(keys[11], (32,), 0.1)
    m3 = unif(keys[12], (32,), 0.1);       v3 = 1.0 + unif(keys[13], (32,), 0.2)
    wfc = unif(keys[14], (NUM_CLASSES, 32 * L3), 0.018)
    bfc = unif(keys[15], (NUM_CLASSES,), 0.018)
    params = (w1, b1, g1, be1, m1, v1, w2, b2, w3, b3, g3, be3, m3, v3, wfc, bfc)

    x = jax.random.normal(keys[16], (B, C_IN, L_IN), jnp.float32)

    prepared = prepare_params(params)          # one-time prep, outside the per-call jitted path
    fwd = jax.jit(cnn_bcs_forward)
    out = jax.block_until_ready(fwd(x, prepared))
    ref = jax.block_until_ready(ref_forward(x, params))
    np.testing.assert_allclose(np.asarray(out), np.asarray(ref), rtol=1e-2, atol=1e-2)
    print("KERNEL_OK")
</pallas_src>

<mosaic_0001>
module attributes {stable_mosaic.version = 11 : i64} {
  func.func @cnn_bcs_kernel(%arg0: i32, %arg1: memref<1x208x100xbf16, #tpu.memory_space<vmem>>, %arg2: memref<100x32xbf16, #tpu.memory_space<vmem>>, %arg3: memref<5x32x20xbf16, #tpu.memory_space<vmem>>, %arg4: memref<100x128xbf16, #tpu.memory_space<vmem>>, %arg5: memref<94x128xf32, #tpu.memory_space<vmem>>, %arg6: memref<8x128xf32, #tpu.memory_space<vmem>>, %arg7: memref<1x1x4xf32, #tpu.memory_space<vmem>>) attributes {dimension_semantics = [#tpu.dimension_semantics<parallel>], iteration_bounds = array<i64: 2>, scalar_prefetch = 0 : i64, scratch_operands = 0 : i64, tpu.core_type = #tpu.core_type<tc>, window_params = [{transform_indices = @transform_0, window_bounds = array<i64: 1, 208, 100>}, {pipeline_mode = #tpu.pipeline_mode<synchronous>, transform_indices = @transform_1, window_bounds = array<i64: 100, 32>}, {pipeline_mode = #tpu.pipeline_mode<synchronous>, transform_indices = @transform_2, window_bounds = array<i64: 5, 32, 20>}, {pipeline_mode = #tpu.pipeline_mode<synchronous>, transform_indices = @transform_3, window_bounds = array<i64: 100, 128>}, {pipeline_mode = #tpu.pipeline_mode<synchronous>, transform_indices = @transform_4, window_bounds = array<i64: 94, 128>}, {pipeline_mode = #tpu.pipeline_mode<synchronous>, transform_indices = @transform_5, window_bounds = array<i64: 8, 128>}, {transform_indices = @transform_6, window_bounds = array<i64: 1, 1, 4>}]} {
    %c0 = arith.constant 0 : index
    %c0_0 = arith.constant 0 : index
    %0 = vector.load %arg6[%c0, %c0_0] : memref<8x128xf32, #tpu.memory_space<vmem>>, vector<8x128xf32>
    %1 = vector.extract_strided_slice %0 {offsets = [0, 0], sizes = [1, 32], strides = [1, 1]} : vector<8x128xf32> to vector<1x32xf32>
    %2 = vector.extract_strided_slice %0 {offsets = [1, 0], sizes = [1, 32], strides = [1, 1]} : vector<8x128xf32> to vector<1x32xf32>
    %3 = vector.extract_strided_slice %0 {offsets = [2, 0], sizes = [1, 20], strides = [1, 1]} : vector<8x128xf32> to vector<1x20xf32>
    %4 = vector.extract_strided_slice %0 {offsets = [3, 0], sizes = [1, 128], strides = [1, 1]} : vector<8x128xf32> to vector<1x128xf32>
    %5 = vector.extract_strided_slice %0 {offsets = [4, 0], sizes = [1, 128], strides = [1, 1]} : vector<8x128xf32> to vector<1x128xf32>
    %6 = vector.extract_strided_slice %0 {offsets = [5, 0], sizes = [1, 4], strides = [1, 1]} : vector<8x128xf32> to vector<1x4xf32>
    %c0_1 = arith.constant 0 : index
    %c0_2 = arith.constant 0 : index
    %c0_3 = arith.constant 0 : index
    %7 = vector.load %arg1[%c0_1, %c0_2, %c0_3] : memref<1x208x100xbf16, #tpu.memory_space<vmem>>, vector<1x208x100xbf16>
    %8 = vector.shape_cast %7 : vector<1x208x100xbf16> to vector<208x100xbf16>
    %c0_4 = arith.constant 0 : index
    %c0_5 = arith.constant 0 : index
    %9 = vector.load %arg2[%c0_4, %c0_5] : memref<100x32xbf16, #tpu.memory_space<vmem>>, vector<100x32xbf16>
    %cst = arith.constant dense<0.000000e+00> : vector<208x32xf32>
    %10 = tpu.matmul %8, %9, %cst {dimension_numbers = #tpu.dot_dimension_numbers<[1], [0], [0], [1], [0, 0, 1, 1], [], []>} : vector<208x100xbf16>, vector<100x32xbf16>, vector<208x32xf32> -> vector<208x32xf32>
    %11 = vector.broadcast %1 : vector<1x32xf32> to vector<208x32xf32>
    %12 = arith.mulf %10, %11 : vector<208x32xf32>
    %13 = vector.broadcast %2 : vector<1x32xf32> to vector<208x32xf32>
    %14 = arith.addf %12, %13 : vector<208x32xf32>
    %cst_6 = arith.constant 0.000000e+00 : f32
    %15 = vector.broadcast %cst_6 : f32 to vector<208x32xf32>
    %16 = arith.maximumf %14, %15 : vector<208x32xf32>
    %17 = vector.extract_strided_slice %16 {offsets = [0, 0], sizes = [104, 32], strides = [1, 1]} : vector<208x32xf32> to vector<104x32xf32>
    %18 = vector.extract_strided_slice %16 {offsets = [104, 0], sizes = [104, 32], strides = [1, 1]} : vector<208x32xf32> to vector<104x32xf32>
    %19 = tpu.iota {dimensions = array<i32: 0>} : vector<104x1xi32>
    %c2_i32 = arith.constant 2 : i32
    %20 = vector.broadcast %c2_i32 : i32 to vector<104x1xi32>
    %21 = arith.cmpi sge, %19, %20 : vector<104x1xi32>
    %c100_i32 = arith.constant 100 : i32
    %22 = vector.broadcast %c100_i32 : i32 to vector<104x1xi32>
    %23 = arith.cmpi slt, %19, %22 : vector<104x1xi32>
    %24 = arith.andi %21, %23 : vector<104x1xi1>
    %25 = arith.maximumf %17, %18 : vector<104x32xf32>
    %cst_7 = arith.constant 0.000000e+00 : f32
    %26 = vector.shape_cast %24 : vector<104x1xi1> to vector<104x1xi1>
    %27 = vector.broadcast %26 : vector<104x1xi1> to vector<104x32xi1>
    %28 = vector.broadcast %cst_7 : f32 to vector<104x32xf32>
    %29 = arith.select %27, %25, %28 : vector<104x32xi1>, vector<104x32xf32>
    %30 = vector.extract_strided_slice %29 {offsets = [0, 0], sizes = [98, 32], strides = [1, 1]} : vector<104x32xf32> to vector<98x32xf32>
    %31 = arith.truncf %30 : vector<98x32xf32> to vector<98x32xbf16>
    %c0_8 = arith.constant 0 : index
    %c0_9 = arith.constant 0 : index
    %c0_10 = arith.constant 0 : index
    %32 = vector.load %arg3[%c0_8, %c0_9, %c0_10] : memref<5x32x20xbf16, #tpu.memory_space<vmem>>, vector<1x32x20xbf16>
    %33 = vector.shape_cast %32 : vector<1x32x20xbf16> to vector<32x20xbf16>
    %cst_11 = arith.constant dense<0.000000e+00> : vector<98x20xf32>
    %34 = tpu.matmul %31, %33, %cst_11 {dimension_numbers = #tpu.dot_dimension_numbers<[1], [0], [0], [1], [0, 0, 1, 1], [], []>} : vector<98x32xbf16>, vector<32x20xbf16>, vector<98x20xf32> -> vector<98x20xf32>
    %35 = vector.extract_strided_slice %29 {offsets = [1, 0], sizes = [98, 32], strides = [1, 1]} : vector<104x32xf32> to vector<98x32xf32>
    %36 = arith.truncf %35 : vector<98x32xf32> to vector<98x32xbf16>
    %c1 = arith.constant 1 : index
    %c0_12 = arith.constant 0 : index
    %c0_13 = arith.constant 0 : index
    %37 = vector.load %arg3[%c1, %c0_12, %c0_13] : memref<5x32x20xbf16, #tpu.memory_space<vmem>>, vector<1x32x20xbf16>
    %38 = vector.shape_cast %37 : vector<1x32x20xbf16> to vector<32x20xbf16>
    %cst_14 = arith.constant dense<0.000000e+00> : vector<98x20xf32>
    %39 = tpu.matmul %36, %38, %cst_14 {dimension_numbers = #tpu.dot_dimension_numbers<[1], [0], [0], [1], [0, 0, 1, 1], [], []>} : vector<98x32xbf16>, vector<32x20xbf16>, vector<98x20xf32> -> vector<98x20xf32>
    %40 = arith.addf %34, %39 : vector<98x20xf32>
    %41 = vector.extract_strided_slice %29 {offsets = [2, 0], sizes = [98, 32], strides = [1, 1]} : vector<104x32xf32> to vector<98x32xf32>
    %42 = arith.truncf %41 : vector<98x32xf32> to vector<98x32xbf16>
    %c2 = arith.constant 2 : index
    %c0_15 = arith.constant 0 : index
    %c0_16 = arith.constant 0 : index
    %43 = vector.load %arg3[%c2, %c0_15, %c0_16] : memref<5x32x20xbf16, #tpu.memory_space<vmem>>, vector<1x32x20xbf16>
    %44 = vector.shape_cast %43 : vector<1x32x20xbf16> to vector<32x20xbf16>
    %cst_17 = arith.constant dense<0.000000e+00> : vector<98x20xf32>
    %45 = tpu.matmul %42, %44, %cst_17 {dimension_numbers = #tpu.dot_dimension_numbers<[1], [0], [0], [1], [0, 0, 1, 1], [], []>} : vector<98x32xbf16>, vector<32x20xbf16>, vector<98x20xf32> -> vector<98x20xf32>
    %46 = arith.addf %40, %45 : vector<98x20xf32>
    %47 = vector.extract_strided_slice %29 {offsets = [3, 0], sizes = [98, 32], strides = [1, 1]} : vector<104x32xf32> to vector<98x32xf32>
    %48 = arith.truncf %47 : vector<98x32xf32> to vector<98x32xbf16>
    %c3 = arith.constant 3 : index
    %c0_18 = arith.constant 0 : index
    %c0_19 = arith.constant 0 : index
    %49 = vector.load %arg3[%c3, %c0_18, %c0_19] : memref<5x32x20xbf16, #tpu.memory_space<vmem>>, vector<1x32x20xbf16>
    %50 = vector.shape_cast %49 : vector<1x32x20xbf16> to vector<32x20xbf16>
    %cst_20 = arith.constant dense<0.000000e+00> : vector<98x20xf32>
    %51 = tpu.matmul %48, %50, %cst_20 {dimension_numbers = #tpu.dot_dimension_numbers<[1], [0], [0], [1], [0, 0, 1, 1], [], []>} : vector<98x32xbf16>, vector<32x20xbf16>, vector<98x20xf32> -> vector<98x20xf32>
    %52 = arith.addf %46, %51 : vector<98x20xf32>
    %53 = vector.extract_strided_slice %29 {offsets = [4, 0], sizes = [98, 32], strides = [1, 1]} : vector<104x32xf32> to vector<98x32xf32>
    %54 = arith.truncf %53 : vector<98x32xf32> to vector<98x32xbf16>
    %c4 = arith.constant 4 : index
    %c0_21 = arith.constant 0 : index
    %c0_22 = arith.constant 0 : index
    %55 = vector.load %arg3[%c4, %c0_21, %c0_22] : memref<5x32x20xbf16, #tpu.memory_space<vmem>>, vector<1x32x20xbf16>
    %56 = vector.shape_cast %55 : vector<1x32x20xbf16> to vector<32x20xbf16>
    %cst_23 = arith.constant dense<0.000000e+00> : vector<98x20xf32>
    %57 = tpu.matmul %54, %56, %cst_23 {dimension_numbers = #tpu.dot_dimension_numbers<[1], [0], [0], [1], [0, 0, 1, 1], [], []>} : vector<98x32xbf16>, vector<32x20xbf16>, vector<98x20xf32> -> vector<98x20xf32>
    %58 = arith.addf %52, %57 : vector<98x20xf32>
    %59 = tpu.iota {dimensions = array<i32: 0>} : vector<98x1xi32>
    %c1_i32 = arith.constant 1 : i32
    %60 = vector.broadcast %c1_i32 : i32 to vector<98x1xi32>
    %61 = arith.cmpi sge, %59, %60 : vector<98x1xi32>
    %c97_i32 = arith.constant 97 : i32
    %62 = vector.broadcast %c97_i32 : i32 to vector<98x1xi32>
    %63 = arith.cmpi slt, %59, %62 : vector<98x1xi32>
    %64 = arith.andi %61, %63 : vector<98x1xi1>
    %65 = vector.broadcast %3 : vector<1x20xf32> to vector<98x20xf32>
    %66 = arith.addf %58, %65 : vector<98x20xf32>
    %cst_24 = arith.constant 0.000000e+00 : f32
    %67 = vector.broadcast %cst_24 : f32 to vector<98x20xf32>
    %68 = arith.maximumf %66, %67 : vector<98x20xf32>
    %cst_25 = arith.constant 0.000000e+00 : f32
    %69 = vector.shape_cast %64 : vector<98x1xi1> to vector<98x1xi1>
    %70 = vector.broadcast %69 : vector<98x1xi1> to vector<98x20xi1>
    %71 = vector.broadcast %cst_25 : f32 to vector<98x20xf32>
    %72 = arith.select %70, %68, %71 : vector<98x20xi1>, vector<98x20xf32>
    %73 = vector.extract_strided_slice %72 {offsets = [0, 0], sizes = [94, 20], strides = [1, 1]} : vector<98x20xf32> to vector<94x20xf32>
    %74 = vector.extract_strided_slice %72 {offsets = [1, 0], sizes = [94, 20], strides = [1, 1]} : vector<98x20xf32> to vector<94x20xf32>
    %75 = vector.extract_strided_slice %72 {offsets = [2, 0], sizes = [94, 20], strides = [1, 1]} : vector<98x20xf32> to vector<94x20xf32>
    %76 = vector.extract_strided_slice %72 {offsets = [3, 0], sizes = [94, 20], strides = [1, 1]} : vector<98x20xf32> to vector<94x20xf32>
    %77 = vector.extract_strided_slice %72 {offsets = [4, 0], sizes = [94, 20], strides = [1, 1]} : vector<98x20xf32> to vector<94x20xf32>
    %78 = tpu.concatenate %73, %74, %75, %76, %77 in 1 : vector<94x20xf32>, vector<94x20xf32>, vector<94x20xf32>, vector<94x20xf32>, vector<94x20xf32> -> vector<94x100xf32>
    %79 = arith.truncf %78 : vector<94x100xf32> to vector<94x100xbf16>
    %c0_26 = arith.constant 0 : index
    %c0_27 = arith.constant 0 : index
    %80 = vector.load %arg4[%c0_26, %c0_27] : memref<100x128xbf16, #tpu.memory_space<vmem>>, vector<100x128xbf16>
    %cst_28 = arith.constant dense<0.000000e+00> : vector<94x128xf32>
    %81 = tpu.matmul %79, %80, %cst_28 {dimension_numbers = #tpu.dot_dimension_numbers<[1], [0], [0], [1], [0, 0, 1, 1], [], []>} : vector<94x100xbf16>, vector<100x128xbf16>, vector<94x128xf32> -> vector<94x128xf32>
    %82 = vector.broadcast %4 : vector<1x128xf32> to vector<94x128xf32>
    %83 = arith.mulf %81, %82 : vector<94x128xf32>
    %84 = vector.broadcast %5 : vector<1x128xf32> to vector<94x128xf32>
    %85 = arith.addf %83, %84 : vector<94x128xf32>
    %cst_29 = arith.constant 0.000000e+00 : f32
    %86 = vector.broadcast %cst_29 : f32 to vector<94x128xf32>
    %87 = arith.maximumf %85, %86 : vector<94x128xf32>
    %c0_30 = arith.constant 0 : index
    %c0_31 = arith.constant 0 : index
    %88 = vector.load %arg5[%c0_30, %c0_31] : memref<94x128xf32, #tpu.memory_space<vmem>>, vector<94x128xf32>
    %89 = arith.mulf %87, %88 : vector<94x128xf32>
    %cst_32 = arith.constant dense<0.000000e+00> : vector<128xf32>
    %90 = vector.multi_reduction <add>, %89, %cst_32 [0] : vector<94x128xf32> to vector<128xf32>
    %91 = vector.shape_cast %90 : vector<128xf32> to vector<1x128xf32>
    %92 = vector.extract_strided_slice %91 {offsets = [0, 0], sizes = [1, 32], strides = [1, 1]} : vector<1x128xf32> to vector<1x32xf32>
    %cst_33 = arith.constant dense<0.000000e+00> : vector<1xf32>
    %93 = vector.multi_reduction <add>, %92, %cst_33 [1] : vector<1x32xf32> to vector<1xf32>
    %94 = vector.shape_cast %93 : vector<1xf32> to vector<1x1xf32>
    %95 = vector.extract_strided_slice %91 {offsets = [0, 32], sizes = [1, 32], strides = [1, 1]} : vector<1x128xf32> to vector<1x32xf32>
    %cst_34 = arith.constant dense<0.000000e+00> : vector<1xf32>
    %96 = vector.multi_reduction <add>, %95, %cst_34 [1] : vector<1x32xf32> to vector<1xf32>
    %97 = vector.shape_cast %96 : vector<1xf32> to vector<1x1xf32>
    %98 = vector.extract_strided_slice %91 {offsets = [0, 64], sizes = [1, 32], strides = [1, 1]} : vector<1x128xf32> to vector<1x32xf32>
    %cst_35 = arith.constant dense<0.000000e+00> : vector<1xf32>
    %99 = vector.multi_reduction <add>, %98, %cst_35 [1] : vector<1x32xf32> to vector<1xf32>
    %100 = vector.shape_cast %99 : vector<1xf32> to vector<1x1xf32>
    %101 = vector.extract_strided_slice %91 {offsets = [0, 96], sizes = [1, 32], strides = [1, 1]} : vector<1x128xf32> to vector<1x32xf32>
    %cst_36 = arith.constant dense<0.000000e+00> : vector<1xf32>
    %102 = vector.multi_reduction <add>, %101, %cst_36 [1] : vector<1x32xf32> to vector<1xf32>
    %103 = vector.shape_cast %102 : vector<1xf32> to vector<1x1xf32>
    %104 = tpu.concatenate %94, %97, %100, %103 in 1 : vector<1x1xf32>, vector<1x1xf32>, vector<1x1xf32>, vector<1x1xf32> -> vector<1x4xf32>
    %105 = arith.addf %104, %6 : vector<1x4xf32>
    %c0_37 = arith.constant 0 : index
    %c0_38 = arith.constant 0 : index
    %c0_39 = arith.constant 0 : index
    %106 = vector.load %arg7[%c0_37, %c0_38, %c0_39] : memref<1x1x4xf32, #tpu.memory_space<vmem>>, vector<1x1x4xf32>
    %107 = vector.shape_cast %106 : vector<1x1x4xf32> to vector<1x4xf32>
    %108 = vector.shape_cast %105 : vector<1x4xf32> to vector<1x1x4xf32>
    tpu.vector_store %arg7[%c0_37, %c0_38, %c0_39], %108 {strides = array<i32>} : memref<1x1x4xf32, #tpu.memory_space<vmem>>, vector<1x1x4xf32>,
    return
  }
  func.func @transform_0(%arg0: i32) -> (i32, i32, i32) {
    %c0_i32 = arith.constant 0 : i32
    %c0_i32_0 = arith.constant 0 : i32
    %c0_i32_1 = arith.constant 0 : i32
    return %arg0, %c0_i32, %c0_i32_0 : i32, i32, i32
  }
  func.func @transform_1(%arg0: i32) -> (i32, i32) {
    %c0_i32 = arith.constant 0 : i32
    %c0_i32_0 = arith.constant 0 : i32
    %c0_i32_1 = arith.constant 0 : i32
    return %c0_i32, %c0_i32_0 : i32, i32
  }
  func.func @transform_2(%arg0: i32) -> (i32, i32, i32) {
    %c0_i32 = arith.constant 0 : i32
    %c0_i32_0 = arith.constant 0 : i32
    %c0_i32_1 = arith.constant 0 : i32
    %c0_i32_2 = arith.constant 0 : i32
    return %c0_i32, %c0_i32_0, %c0_i32_1 : i32, i32, i32
  }
  func.func @transform_3(%arg0: i32) -> (i32, i32) {
    %c0_i32 = arith.constant 0 : i32
    %c0_i32_0 = arith.constant 0 : i32
    %c0_i32_1 = arith.constant 0 : i32
    return %c0_i32, %c0_i32_0 : i32, i32
  }
  func.func @transform_4(%arg0: i32) -> (i32, i32) {
    %c0_i32 = arith.constant 0 : i32
    %c0_i32_0 = arith.constant 0 : i32
    %c0_i32_1 = arith.constant 0 : i32
    return %c0_i32, %c0_i32_0 : i32, i32
  }
  func.func @transform_5(%arg0: i32) -> (i32, i32) {
    %c0_i32 = arith.constant 0 : i32
    %c0_i32_0 = arith.constant 0 : i32
    %c0_i32_1 = arith.constant 0 : i32
    return %c0_i32, %c0_i32_0 : i32, i32
  }
  func.func @transform_6(%arg0: i32) -> (i32, i32, i32) {
    %c0_i32 = arith.constant 0 : i32
    %c0_i32_0 = arith.constant 0 : i32
    %c0_i32_1 = arith.constant 0 : i32
    return %arg0, %c0_i32, %c0_i32_0 : i32, i32, i32
  }
}

</mosaic_0001>

<bundles_post_ra>
// kernel: cnn_bcs_forward.1
= control target key start
LH: loop header
LB: loop body
LE: loop exit
PB: predicated region body
PF: predicated region fallthrough
CT: control target
= control target key end

     0   :  { %11 = vsyncpa [#allocation3], 0  ;;  %s4003_s0 = inlined_call_operand.vmem [shape: bf16[2,208,100], index: 0, kind: input, shape index: {}]   ;;  %s4004_s1 = inlined_call_operand.vmem [shape: bf16[100,32], index: 1, kind: input, shape index: {}]   ;;  %s4005_s2 = inlined_call_operand.vmem [shape: bf16[5,32,20], index: 2, kind: input, shape index: {}]   ;;  %s4006_s3 = inlined_call_operand.vmem [shape: bf16[100,128], index: 3, kind: input, shape index: {}]   ;;  %s4007_s4 = inlined_call_operand.vmem [shape: f32[94,128], index: 4, kind: input, shape index: {}]   ;;  %s4008_s5 = inlined_call_operand.vmem [shape: f32[8,128], index: 5, kind: input, shape index: {}]   ;;  %s4009_s6 = inlined_call_operand.hbm [shape: f32[2,1,4], index: 6, kind: output, shape index: {}]  }
   0x1   :  { %13 = vsyncpa [#allocation3 + $0x1], 0  ;;  %s3085_s21 = smov 0   ;;  %s3087_s22 = smov 0  }
   0x2   :  { %s3089_s23 = smov 0   ;;  %s3091_s24 = smov 0  }
   0x3 LB: > { %s3106_s25 = sadd.s32 4294967295, %s3038_s24   ;;  %s2319_s26 = sadd.s32 4294967294, %s3038_s24   ;;  %s3038_s24 = sphi %s3091_s24, %s4015_s24   ;;  %s3034_s23 = sphi %s3089_s23, %s4014_s23   ;;  %s3030_s22 = sphi %s3087_s22, %s4013_s22   ;;  %s3026_s21 = sphi %s3085_s21, %s4012_s21  }
   0x4   : > { %s3110_s27 = sadd.s32 1, %s3038_s24   ;;  %s157_s28 = sadd.s32 1, %s3034_s23 }
   0x5   : > { %s154_s29 = ssub.s32 %s3038_s24, %s3110_s27  ;;  %p167_p0 = scmp.ne.s32.totalorder %s3034_s23, %s3030_s22 }
   0x6   : > { %p155_p1 = scmp.eq.s32.totalorder %s154_s29, 0  ;;  %p168_p2 = scmp.eq.s32.totalorder %s3106_s25, 1 }
   0x7   : > { %p173_p3 = scmp.ne.s32.totalorder %s3030_s22, %s3026_s21  ;;  %p174_p4 = scmp.eq.s32.totalorder %s2319_s26, 1 }
   0x8   : > { %s3121_s30 = scalar_select %p155_p1, %s3034_s23, %s157_s28  }
   0x9   : > { %p3123_p5 = por %p168_p2, %p167_p0  ;;  %p3127_p6 = por %p174_p4, %p173_p3 }
   0xa   : > { %p2322_p7 = scmp.ge.s32.totalorder %s3038_s24, 1  ;;  %p215_p8 = scmp.lt.s32.totalorder %s3038_s24, 3 }
   0xc   : > { %p216_p9 = pnand %p2322_p7, %p215_p8 }
   0xd   : > { %v2938_v0 = vld [vmem:[%s4004_s1] sm:$0xff] (!%p216_p9)   ;;  %v3040_v1 = vmov (!%p216_p9), 0.0   ;;  %v2939_v2 = vld [vmem:[%s4004_s1 + $0x8] sm:$0xff] (!%p216_p9)   ;;  %vm3041_vm0 = vmmov (!%p216_p9), 0   ;;  %p244_p10 = scmp.lt.s32.totalorder (!%p216_p9), %s3106_s25, 1  ;;  %v2940_v3 = vld [vmem:[%s4004_s1 + $0x10] sm:$0xff] (!%p216_p9)   ;;  %v575_v40 = vlaneseq (!%p216_p9) }
   0xe   : > { %219 = sbr.rel (%p216_p9) target bundleno = 1425 (0x591), region = 44  ;;  %2512 = vmatprep.subr.bf16.mxu0 (!%p216_p9), %v3040_v1  ;;  %2764 = vmatprep.subr.bf16.mxu1 (!%p216_p9), %v3040_v1  ;;  %v2941_v4 = vld [vmem:[%s4004_s1 + $0x18] sm:$0xff] (!%p216_p9)   ;;  %v2942_v5 = vld [vmem:[%s4004_s1 + $0x20] sm:$0xff] (!%p216_p9)   ;;  %v2944_v6 = vld [vmem:[%s4004_s1 + $0x30] ss:$0 sps:$4 sm:$0x33] (!%p216_p9)  }
   0xf   : > { %2513 = vmatpush3.bf16.msra.mxu0 (!%p216_p9), %v2938_v0  ;;  %2526 = vmatprep.mubr.msk.bf16.mxu0 (!%p216_p9), %vm3041_vm0, %v3040_v1  ;;  %v2943_v7 = vld [vmem:[%s4004_s1 + $0x28] sm:$0xff] (!%p216_p9)   ;;  %vm434_vm1 = vcmask (!%p216_p9), 1041408   ;;  %vm394_vm2 = vcmask (!%p216_p9), 818176   ;;  %v2958_v22 = vld [vmem:[%s4005_s2 + $0x10] sm:$0xff] (!%p216_p9)   ;;  %v2959_v23 = vld [vmem:[%s4005_s2 + $0x18] sm:$0xff] (!%p216_p9)   ;;  %v3247_v44 = vshrl.u32 (!%p216_p9), %v575_v40, 7 }
  0x10   : > { %2514 = vmatprep.subr.bf16.mxu0 (!%p216_p9), %v3040_v1  ;;  %2586 = vmatprep.mubr.msk.bf16.mxu1 (!%p216_p9), %vm3041_vm0, %v3040_v1  ;;  %v436_v8 = vsel (!%p216_p9), %vm434_vm1, %v2944_v6, 0  ;;  %v3253_v47 = vld [vmem:[%s4008_s5] sm:$0xff] (!%p216_p9)  ;;  %vm782_vm4 = vsmask.f32 (!%p216_p9), 7424  ;;  %vm850_vm5 = vcmask (!%p216_p9), 261120   ;;  %vm1086_vm8 = vcmask (!%p216_p9), 1046528  }
  0x11   : > { %2766 = vmatpush3.bf16.msra.mxu1 (!%p216_p9), %v2958_v22  ;;  %v577_v46 = vsub.s32 (!%p216_p9), 0, %v3247_v44  ;;  %v607_v52 = vsub.s32 (!%p216_p9), 1, %v3247_v44  ;;  %vm675_vm3 = vcmp.ge.s32.totalorder (!%p216_p9), %v3247_v44, 2  ;;  %vm1239_vm6 = vsmask.f32 (!%p216_p9), 6400  ;;  %s3042_s15 = smov (!%p216_p9), 40  }
  0x12   : > { %2765 = vmatprep.subr.bf16.mxu1 (!%p216_p9), %v3040_v1  ;;  %vm1406_vm9 = vcmask (!%p216_p9), 1045504   ;;  %vm1554_vm10 = vcmp.ge.s32.totalorder (!%p216_p9), %v3247_v44, 1  ;;  %vm1795_vm11 = vcmask (!%p216_p9), 1044480   ;;  %vm1857_vm12 = vcmask (!%p216_p9), 1043456   ;;  %s3045_s28 = smov (!%p216_p9), 80   ;;  %s3047_s20 = smov (!%p216_p9), 96  }
  0x13   : > { %2515 = vmatpush3.bf16.msra.mxu0 (!%p216_p9), %v2939_v2  ;;  %v3260_v51 = vrot.slane (!%p216_p9), %v3253_v47, %v577_v46  ;;  %v3265_v55 = vrot.slane (!%p216_p9), %v3253_v47, %v607_v52  ;;  %vm1919_vm14 = vcmask (!%p216_p9), 162816   ;;  %vm1932_vm15 = vcmask (!%p216_p9), 326656   ;;  %s3048_s26 = smov (!%p216_p9), 32   ;;  %s2431_s29 = sshll.u32 (!%p216_p9), %s3106_s25, 4 }
  0x14   : > { %2516 = vmatprep.subr.bf16.mxu0 (!%p216_p9), %v3040_v1 }
  0x15   : > { %s245_s13 = scalar_select %p244_p10, %s3106_s25, 1  ;;  %2767 = vmatpush3.bf16.msra.mxu1 %v2959_v23 }
  0x16   : > { %2610 = vmatprep.subr.bf16.mxu1 %v3040_v1  ;;  %s3049_s25 = smov [#allocation2]  }
  0x17   : > { %s2769_s16 = smul.u32 104, %s245_s13  ;;  %2517 = vmatpush3.bf16.msra.mxu0 %v2940_v3  ;;  %s3961_s13 = scalar_lea.hbm %s4009_s6, %s2431_s29 }
  0x18   : > { %2518 = vmatprep.subr.bf16.mxu0 %v3040_v1 }
  0x19   : > { %s3155_s19 = scalar_lea.vmem %s4003_s0, %s2769_s16  ;;  %s3043_s16 = smov 20  }
  0x1a   : > { %v2945_v9 = vld [vmem:[%s3155_s19] sm:$0xff]   ;;  %v2946_v10 = vld [vmem:[%s3155_s19 + $0x8] sm:$0xff]   ;;  %v2947_v11 = vld [vmem:[%s3155_s19 + $0x10] sm:$0xff]  }
  0x1b   : > { %2519 = vmatpush3.bf16.msra.mxu0 %v2941_v4  ;;  %v2948_v12 = vld [vmem:[%s3155_s19 + $0x18] sm:$0xff]   ;;  %v2949_v13 = vld [vmem:[%s3155_s19 + $0x20] sm:$0xff]   ;;  %v2950_v14 = vld [vmem:[%s3155_s19 + $0x28] sm:$0xff]  }
  0x1c   : > { %2520 = vmatprep.subr.bf16.mxu0 %v3040_v1  ;;  %v2951_v15 = vld [vmem:[%s3155_s19 + $0x30] sm:$0xff]   ;;  %v2952_v16 = vld [vmem:[%s3155_s19 + $0x38] sm:$0xff]   ;;  %v2953_v17 = vld [vmem:[%s3155_s19 + $0x40] sm:$0xff]  }
  0x1d   : > { %v2954_v18 = vld [vmem:[%s3155_s19 + $0x48] sm:$0xff]   ;;  %v2955_v19 = vld [vmem:[%s3155_s19 + $0x50] sm:$0xff]   ;;  %v2956_v20 = vld [vmem:[%s3155_s19 + $0x58] sm:$0xff]  }
  0x1e   : > { %v2957_v21 = vld [vmem:[%s3155_s19 + $0x60] sm:$0xff]   ;;  %s3044_s19 = smov 60  }
  0x1f   : > { %2521 = vmatpush3.bf16.msra.mxu0 %v2942_v5 }
  0x20   : > { %2522 = vmatprep.subr.bf16.mxu0 %v3040_v1 }
  0x23   : > { %2523 = vmatpush3.bf16.msra.mxu0 %v2943_v7 }
  0x24   : > { %2524 = vmatprep.subr.bf16.mxu0 %v3040_v1 }
  0x27   : > { %2525 = vmatpush3.bf16.msra.mxu0 %v436_v8 }
  0x28   : > { %2578 = vmatprep.subr.bf16.mxu0 %v3040_v1 }
  0x2a   : > { %2527 = vmatmul.mubr.msk.bf16.vlgmr.msra.gmra.mrb[0].mxu0 %vm394_vm2, %v2945_v9 }
  0x2b   : > { %2530 = vmatprep.mubr.msk.bf16.mxu0 %vm3041_vm0, %v3040_v1  ;;  %2579 = vmatpush3.bf16.msra.mxu0 %v2958_v22 }
  0x2c   : > { %2580 = vmatprep.subr.bf16.mxu0 %v3040_v1 }
  0x2f   : > { %2581 = vmatpush3.bf16.msra.mxu0 %v2959_v23 }
  0x30   : > { %2674 = vmatprep.subr.bf16.mxu0 %v3040_v1 }
  0x32   : > { %2531 = vmatmul.mubr.msk.bf16.gmra.mrb[4].mxu0 %vm394_vm2, %v2946_v10 }
  0x33   : > { %2534 = vmatprep.mubr.msk.bf16.mxu0 %vm3041_vm0, %v3040_v1 }
  0x3a   : > { %2535 = vmatmul.mubr.msk.bf16.gmra.mrb[8].mxu0 %vm394_vm2, %v2947_v11 }
  0x3b   : > { %2538 = vmatprep.mubr.msk.bf16.mxu0 %vm3041_vm0, %v3040_v1 }
  0x42   : > { %2539 = vmatmul.mubr.msk.bf16.gmra.mrb[12].mxu0 %vm394_vm2, %v2948_v12 }
  0x43   : > { %2542 = vmatprep.mubr.msk.bf16.mxu0 %vm3041_vm0, %v3040_v1 }
  0x4a   : > { %2543 = vmatmul.mubr.msk.bf16.gmra.mrb[16].mxu0 %vm394_vm2, %v2949_v13 }
  0x4b   : > { %2546 = vmatprep.mubr.msk.bf16.mxu0 %vm3041_vm0, %v3040_v1 }
  0x52   : > { %2547 = vmatmul.mubr.msk.bf16.gmra.mrb[20].mxu0 %vm394_vm2, %v2950_v14 }
  0x53   : > { %2550 = vmatprep.mubr.msk.bf16.mxu0 %vm3041_vm0, %v3040_v1 }
  0x5a   : > { %2551 = vmatmul.mubr.msk.bf16.gmra.mrb[24].mxu0 %vm394_vm2, %v2951_v15 }
  0x5b   : > { %2554 = vmatprep.mubr.msk.bf16.mxu0 %vm3041_vm0, %v3040_v1 }
  0x62   : > { %2555 = vmatmul.mubr.msk.bf16.gmra.mrb[28].mxu0 %vm394_vm2, %v2952_v16 }
  0x63   : > { %2558 = vmatprep.mubr.msk.bf16.mxu0 %vm3041_vm0, %v3040_v1 }
  0x6a   : > { %2559 = vmatmul.mubr.msk.bf16.gmra.mrb[32].mxu0 %vm394_vm2, %v2953_v17 }
  0x6b   : > { %2562 = vmatprep.mubr.msk.bf16.mxu0 %vm3041_vm0, %v3040_v1 }
  0x72   : > { %2563 = vmatmul.mubr.msk.bf16.gmra.mrb[36].mxu0 %vm394_vm2, %v2954_v18 }
  0x73   : > { %2566 = vmatprep.mubr.msk.bf16.mxu0 %vm3041_vm0, %v3040_v1 }
  0x7a   : > { %2567 = vmatmul.mubr.msk.bf16.gmra.mrb[40].mxu0 %vm394_vm2, %v2955_v19 }
  0x7b   : > { %2570 = vmatprep.mubr.msk.bf16.mxu0 %vm3041_vm0, %v3040_v1 }
  0x82   : > { %2571 = vmatmul.mubr.msk.bf16.gmra.mrb[44].mxu0 %vm394_vm2, %v2956_v20 }
  0x83   : > { %2574 = vmatprep.mubr.msk.bf16.mxu0 %vm3041_vm0, %v3040_v1 }
  0x8a   : > { %2575 = vmatmul.mubr.msk.bf16.gmra.mrb[48].mxu0 %vm394_vm2, %v2957_v21 }
  0x8b   : > { %2582 = vmatprep.mubr.msk.bf16.mxu0 %vm3041_vm0, %v3040_v1 }
  0xfd   : > { %v472_v24 = vpop.f32.mrb[0].mxu0 }
  0xfe   : > { %v2528_v25 = vpop.f32.mrb[1].mxu0  ;;  %v579_v54 = vmul.f32 %v3260_v51, %v472_v24 }
  0xff   : > { %v475_v26 = vpop.f32.mrb[2].mxu0 }
 0x100   : > { %v2529_v27 = vpop.f32.mrb[3].mxu0  ;;  %v609_v59 = vadd.f32 %v3265_v55, %v579_v54  ;;  %v580_v62 = vmul.f32 %v3260_v51, %v475_v26 }
 0x102   : > { %v635_v0 = vmax.f32 %v609_v59, 0.0  ;;  %v610_v5 = vadd.f32 %v3265_v55, %v580_v62 }
 0x104   : > { %v636_v14 = vmax.f32 %v610_v5, 0.0 }
 0x105   : > { %v480_v28 = vpop.f32.mrb[4].mxu0 }
 0x106   : > { %v2532_v29 = vpop.f32.mrb[5].mxu0  ;;  %v581_v2 = vmul.f32 %v3260_v51, %v480_v28 }
 0x107   : > { %v483_v30 = vpop.f32.mrb[6].mxu0 }
 0x108   : > { %v2533_v31 = vpop.f32.mrb[7].mxu0  ;;  %v611_v10 = vadd.f32 %v3265_v55, %v581_v2  ;;  %v582_v15 = vmul.f32 %v3260_v51, %v483_v30 }
 0x10a   : > { %v637_v18 = vmax.f32 %v611_v10, 0.0  ;;  %v612_v24 = vadd.f32 %v3265_v55, %v582_v15 }
 0x10d   : > { %v488_v32 = vpop.f32.mrb[8].mxu0 }
 0x10e   : > { %v2536_v33 = vpop.f32.mrb[9].mxu0  ;;  %v583_v19 = vmul.f32 %v3260_v51, %v488_v32 }
 0x10f   : > { %v3237_v34 = vpop.f32.mrb[10].mxu0 }
 0x110   : > { %v2537_v35 = vpop.f32.mrb[11].mxu0  ;;  %v613_v30 = vadd.f32 %v3265_v55, %v583_v19 }
 0x111   : > { %v584_v35 = vmul.f32 %v3260_v51, %v3237_v34 }
 0x112   : > { %v639_v46 = vmax.f32 %v613_v30, 0.0 }
 0x115   : > { %v3239_v36 = vpop.f32.mrb[12].mxu0 }
 0x116   : > { %v2540_v37 = vpop.f32.mrb[13].mxu0 }
 0x117   : > { %v3241_v38 = vpop.f32.mrb[14].mxu0  ;;  %v638_v37 = vmax.f32 %v612_v24, 0.0 }
 0x118   : > { %v2541_v39 = vpop.f32.mrb[15].mxu0 }
 0x11d   : > { %v3243_v41 = vpop.f32.mrb[16].mxu0 }
 0x11e   : > { %v2544_v42 = vpop.f32.mrb[17].mxu0 }
 0x11f   : > { %v3245_v43 = vpop.f32.mrb[18].mxu0 }
 0x120   : > { %v2545_v45 = vpop.f32.mrb[19].mxu0 }
 0x121   : > { %v585_v45 = vmul.f32 %v3260_v51, %v3239_v36 }
 0x125   : > { %v3255_v48 = vpop.f32.mrb[20].mxu0 }
 0x126   : > { %v2548_v49 = vpop.f32.mrb[21].mxu0 }
 0x127   : > { %v3257_v50 = vpop.f32.mrb[22].mxu0 }
 0x128   : > { %v2549_v53 = vpop.f32.mrb[23].mxu0 }
 0x129   : > { %v614_v53 = vadd.f32 %v3265_v55, %v584_v35 }
 0x12b   : > { %v640_v5 = vmax.f32 %v614_v53, 0.0 }
 0x12d   : > { %v3267_v56 = vpop.f32.mrb[24].mxu0 }
 0x12e   : > { %v2552_v57 = vpop.f32.mrb[25].mxu0 }
 0x12f   : > { %v523_v58 = vpop.f32.mrb[26].mxu0 }
 0x130   : > { %v592_v60 = vmul.f32 %v3260_v51, %v523_v58  ;;  %v2553_v61 = vpop.f32.mrb[27].mxu0 }
 0x131   : > { %v615_v61 = vadd.f32 %v3265_v55, %v585_v45 }
 0x132   : > { %v622_v63 = vadd.f32 %v3265_v55, %v592_v60 }
 0x133   : > { %v641_v15 = vmax.f32 %v615_v61, 0.0 }
 0x134   : > { %v648_v3 = vmax.f32 %v622_v63, 0.0 }
 0x135   : > { %v528_v4 = vpop.f32.mrb[28].mxu0 }
 0x136   : > { %v714_v6 = vmax.f32 %v635_v0, %v648_v3  ;;  %v593_v7 = vmul.f32 %v3260_v51, %v528_v4  ;;  %v2556_v8 = vpop.f32.mrb[29].mxu0 }
 0x137   : > { %v531_v9 = vpop.f32.mrb[30].mxu0 }
 0x138   : > { %v623_v11 = vadd.f32 %v3265_v55, %v593_v7  ;;  %v594_v12 = vmul.f32 %v3260_v51, %v531_v9  ;;  %v2557_v13 = vpop.f32.mrb[31].mxu0  ;;  %v753_v22 = vsel %vm675_vm3, %v714_v6, 0.0  ;;  %v586_v6 = vmul.f32 %v3260_v51, %v3241_v38 }
 0x139   : > { %vm2241_vm3 = vcmask 15360  }
 0x13a   : > { %v649_v16 = vmax.f32 %v623_v11, 0.0  ;;  %v624_v17 = vadd.f32 %v3265_v55, %v594_v12  ;;  %v2960_v11 = vld [vmem:[%s4005_s2 + $0x30] sm:$0xff]   ;;  %v587_v12 = vmul.f32 %v3260_v51, %v3243_v41 }
 0x13c   : > { %v715_v20 = vmax.f32 %v636_v14, %v649_v16  ;;  %v650_v21 = vmax.f32 %v624_v17, 0.0 }
 0x13d   : > { %v536_v23 = vpop.f32.mrb[32].mxu0 }
 0x13e   : > { %v3284_v25 = vpack.c.bf16 %v715_v20, %v753_v22  ;;  %v716_v26 = vmax.f32 %v637_v18, %v650_v21  ;;  %v595_v27 = vmul.f32 %v3260_v51, %v536_v23  ;;  %v2560_v28 = vpop.f32.mrb[33].mxu0  ;;  %v616_v18 = vadd.f32 %v3265_v55, %v586_v6 }
 0x13f   : > { %v539_v29 = vpop.f32.mrb[34].mxu0 }
 0x140   : > { %v625_v31 = vadd.f32 %v3265_v55, %v595_v27  ;;  %v596_v33 = vmul.f32 %v3260_v51, %v539_v29  ;;  %v2561_v32 = vpop.f32.mrb[35].mxu0  ;;  %v786_v42 = vshll.u32 %v3284_v25, 16  ;;  %v784_v63 = vshrl.u32 %v3284_v25, 16 }
 0x141   : > { %v617_v27 = vadd.f32 %v3265_v55, %v587_v12 }
 0x142   : > { %v651_v39 = vmax.f32 %v625_v31, 0.0  ;;  %v626_v40 = vadd.f32 %v3265_v55, %v596_v33  ;;  %v788_v60 = vrot.slane %v786_v42, 1  ;;  %v1240_v20 = vrot.slane %v784_v63, 1 }
 0x143   : > { %v1241_v21 = vrot.slane %v786_v42, 2  ;;  %v643_v53 = vmax.f32 %v617_v27, 0.0 }
 0x144   : > { %v717_v49 = vmax.f32 %v638_v37, %v651_v39  ;;  %v652_v52 = vmax.f32 %v626_v40, 0.0  ;;  %v789_v9 = vor.u32 %v788_v60, %v784_v63  ;;  %v642_v37 = vmax.f32 %v616_v18, 0.0 }
 0x145   : > { %v544_v54 = vpop.f32.mrb[36].mxu0  ;;  %v588_v39 = vmul.f32 %v3260_v51, %v3245_v43  ;;  %v1242_v40 = vor.u32 %v1241_v21, %v1240_v20  ;;  %v591_v18 = vmul.f32 %v3260_v51, %v3267_v56 }
 0x146   : > { %v3297_v57 = vpack.c.bf16 %v717_v49, %v716_v26  ;;  %v718_v58 = vmax.f32 %v639_v46, %v652_v52  ;;  %v597_v34 = vmul.f32 %v3260_v51, %v544_v54  ;;  %v2564_v59 = vpop.f32.mrb[37].mxu0  ;;  %v2961_v26 = vld [vmem:[%s4005_s2 + $0x38] sm:$0xff]   ;;  %v2962_v52 = vld [vmem:[%s4005_s2] sm:$0xff]   ;;  %v589_v54 = vmul.f32 %v3260_v51, %v3255_v48 }
 0x147   : > { %v547_v62 = vpop.f32.mrb[38].mxu0 }
 0x148   : > { %v627_v36 = vadd.f32 %v3265_v55, %v597_v34  ;;  %v598_v0 = vmul.f32 %v3260_v51, %v547_v62  ;;  %v2565_v2 = vpop.f32.mrb[39].mxu0  ;;  %v791_v3 = vshll.u32 %v3297_v57, 16  ;;  %v795_v4 = vshrl.u32 %v3297_v57, 16 }
 0x149   : > { %v618_v62 = vadd.f32 %v3265_v55, %v588_v39 }
 0x14a   : > { %v653_v7 = vmax.f32 %v627_v36, 0.0  ;;  %v628_v8 = vadd.f32 %v3265_v55, %v598_v0  ;;  %v793_v10 = vrot.slane %v791_v3, 1  ;;  %v1243_v13 = vrot.slane %v795_v4, 1 }
 0x14b   : > { %v1244_v14 = vrot.slane %v791_v3, 2  ;;  %v2963_v3 = vld [vmem:[%s4005_s2 + $0x8] sm:$0xff]   ;;  %v644_v12 = vmax.f32 %v618_v62, 0.0 }
 0x14c   : > { %v719_v16 = vmax.f32 %v640_v5, %v653_v7  ;;  %v654_v17 = vmax.f32 %v628_v8, 0.0  ;;  %v794_v38 = vsel %vm782_vm4, %v789_v9, %v793_v10  ;;  %v797_v46 = vor.u32 %v795_v4, %v793_v10 }
 0x14d   : > { %v552_v19 = vpop.f32.mrb[40].mxu0  ;;  %2583 = vmatmul.mubr.msk.bf16.vlgmr.msra.gmra.mrb[52].mxu0 %vm850_vm5, %v794_v38  ;;  %v1245_v29 = vor.u32 %v1244_v14, %v1243_v13  ;;  %v619_v4 = vadd.f32 %v3265_v55, %v589_v54  ;;  %v590_v13 = vmul.f32 %v3260_v51, %v3257_v50 }
 0x14e   : > { %v3317_v22 = vpack.c.bf16 %v719_v16, %v718_v58  ;;  %v720_v23 = vmax.f32 %v641_v15, %v654_v17  ;;  %v599_v24 = vmul.f32 %v3260_v51, %v552_v19  ;;  %v2568_v41 = vpop.f32.mrb[41].mxu0  ;;  %2675 = vmatpush3.bf16.msra.mxu0 %v2960_v11  ;;  %2678 = vmatprep.mubr.msk.bf16.mxu0 %vm3041_vm0, %v3040_v1 }
 0x14f   : > { %v555_v28 = vpop.f32.mrb[42].mxu0  ;;  %2676 = vmatprep.subr.bf16.mxu0 %v3040_v1  ;;  %v1246_v61 = vsel %vm1239_vm6, %v1242_v40, %v1245_v29  ;;  %v645_v38 = vmax.f32 %v619_v4, 0.0  ;;  %v620_v41 = vadd.f32 %v3265_v55, %v590_v13 }
 0x150   : > { %v629_v30 = vadd.f32 %v3265_v55, %v599_v24  ;;  %v600_v31 = vmul.f32 %v3260_v51, %v555_v28  ;;  %v2569_v33 = vpop.f32.mrb[43].mxu0  ;;  %v799_v32 = vshll.u32 %v3317_v22, 16  ;;  %v803_v35 = vshrl.u32 %v3317_v22, 16 }
 0x152   : > { %v655_v42 = vmax.f32 %v629_v30, 0.0  ;;  %v630_v45 = vadd.f32 %v3265_v55, %v600_v31  ;;  %2677 = vmatpush3.bf16.msra.mxu0 %v2961_v26  ;;  %v801_v49 = vrot.slane %v799_v32, 1  ;;  %v1247_v58 = vrot.slane %v803_v35, 1 }
 0x153   : > { %v1248_v34 = vrot.slane %v799_v32, 2 }
 0x154   : > { %v721_v59 = vmax.f32 %v642_v37, %v655_v42  ;;  %v656_v43 = vmax.f32 %v630_v45, 0.0  ;;  %v802_v60 = vsel %vm782_vm4, %v797_v46, %v801_v49  ;;  %v805_v16 = vor.u32 %v803_v35, %v801_v49 }
 0x155   : > { %v560_v63 = vpop.f32.mrb[44].mxu0  ;;  %2587 = vmatmul.mubr.msk.bf16.vlgmr.msra.gmra.mrb[0].mxu1 %vm850_vm5, %v802_v60  ;;  %2679 = vmatmul.mubr.msk.bf16.vlgmr.msra.gmra.mrb[56].mxu0 %vm850_vm5, %v1246_v61  ;;  %v1249_v6 = vor.u32 %v1248_v34, %v1247_v58  ;;  %v646_v42 = vmax.f32 %v620_v41, 0.0  ;;  %v3384_v45 = vadd.s32 96, %v3247_v44 }
 0x156   : > { %v3344_v36 = vpack.c.bf16 %v721_v59, %v720_v23  ;;  %v722_v0 = vmax.f32 %v643_v53, %v656_v43  ;;  %v601_v48 = vmul.f32 %v3260_v51, %v560_v63  ;;  %2611 = vmatpush3.bf16.msra.mxu1 %v2962_v52  ;;  %v2572_v2 = vpop.f32.mrb[45].mxu0  ;;  %2590 = vmatprep.mubr.msk.bf16.mxu1 %vm3041_vm0, %v3040_v1 }
 0x157   : > { %v563_v5 = vpop.f32.mrb[46].mxu0  ;;  %2682 = vmatprep.mubr.msk.bf16.mxu0 %vm3041_vm0, %v3040_v1  ;;  %2612 = vmatprep.subr.bf16.mxu1 %v3040_v1  ;;  %v1250_v50 = vsel %vm1239_vm6, %v1245_v29, %v1249_v6  ;;  %v621_v29 = vadd.f32 %v3265_v55, %v591_v18  ;;  %vm700_vm7 = vcmp.lt.s32.totalorder %v3384_v45, 100  ;;  %vm1579_vm13 = vcmp.lt.s32.totalorder %v3384_v45, 97 }
 0x158   : > { %v631_v7 = vadd.f32 %v3265_v55, %v601_v48  ;;  %v602_v8 = vmul.f32 %v3260_v51, %v563_v5  ;;  %v2573_v9 = vpop.f32.mrb[47].mxu0  ;;  %v807_v10 = vshll.u32 %v3344_v36, 16  ;;  %v811_v11 = vshrl.u32 %v3344_v36, 16 }
 0x159   : > { %v647_v54 = vmax.f32 %v621_v29, 0.0 }
 0x15a   : > { %v657_v14 = vmax.f32 %v631_v7, 0.0  ;;  %v632_v15 = vadd.f32 %v3265_v55, %v602_v8  ;;  %v809_v17 = vrot.slane %v807_v10, 1  ;;  %2613 = vmatpush3.bf16.msra.mxu1 %v2963_v3  ;;  %v1251_v19 = vrot.slane %v811_v11, 1 }
 0x15b   : > { %v1252_v20 = vrot.slane %v807_v10, 2  ;;  %2642 = vmatprep.subr.bf16.mxu1 %v3040_v1 }
 0x15c   : > { %v723_v21 = vmax.f32 %v644_v12, %v657_v14  ;;  %v658_v23 = vmax.f32 %v632_v15, 0.0  ;;  %v810_v24 = vsel %vm782_vm4, %v805_v16, %v809_v17  ;;  %v813_v52 = vor.u32 %v811_v11, %v809_v17 }
 0x15d   : > { %v568_v26 = vpop.f32.mrb[48].mxu0  ;;  %2591 = vmatmul.mubr.msk.bf16.gmra.mrb[4].mxu1 %vm850_vm5, %v810_v24  ;;  %2683 = vmatmul.mubr.msk.bf16.gmra.mrb[60].mxu0 %vm850_vm5, %v1250_v50  ;;  %v1253_v33 = vor.u32 %v1252_v20, %v1251_v19  ;;  %v2964_v20 = vld [vmem:[%s4005_s2 + $0x20] sm:$0xff]   ;;  %v1087_v24 = vrot.slane %v3284_v25, 1 }
 0x15e   : > { %v3371_v27 = vpack.c.bf16 %v723_v21, %v722_v0  ;;  %v724_v56 = vmax.f32 %v645_v38, %v658_v23  ;;  %v603_v28 = vmul.f32 %v3260_v51, %v568_v26  ;;  %v2576_v30 = vpop.f32.mrb[49].mxu0  ;;  %2594 = vmatprep.mubr.msk.bf16.mxu1 %vm3041_vm0, %v3040_v1  ;;  %2686 = vmatprep.mubr.msk.bf16.mxu0 %vm3041_vm0, %v3040_v1  ;;  %v2965_v21 = vld [vmem:[%s4005_s2 + $0x28] sm:$0xff]   ;;  %v1088_v23 = vrot.slane %v3297_v57, 1  ;;  %v2966_v50 = vld [vmem:[%s4005_s2 + $0x40] sm:$0xff]  }
 0x15f   : > { %v571_v31 = vpop.f32.mrb[50].mxu0  ;;  %v1254_v60 = vsel %vm1239_vm6, %v1249_v6, %v1253_v33  ;;  %v2967_v26 = vld [vmem:[%s4005_s2 + $0x48] sm:$0xff]   ;;  %v1092_v30 = vrot.slane %v3344_v36, 1 }
 0x160   : > { %v633_v32 = vadd.f32 %v3265_v55, %v603_v28  ;;  %v604_v35 = vmul.f32 %v3260_v51, %v571_v31  ;;  %v2577_v37 = vpop.f32.mrb[51].mxu0  ;;  %v815_v39 = vshll.u32 %v3371_v27, 16  ;;  %v819_v40 = vshrl.u32 %v3371_v27, 16 }
 0x161   : > { %v1089_v41 = vsel %vm1086_vm8, %v1087_v24, %v1088_v23  ;;  %v1094_v31 = vrot.slane %v3371_v27, 1 }
 0x162   : > { %v659_v46 = vmax.f32 %v633_v32, 0.0  ;;  %v634_v49 = vadd.f32 %v3265_v55, %v604_v35  ;;  %v817_v53 = vrot.slane %v815_v39, 1  ;;  %v1255_v58 = vrot.slane %v819_v40, 1 }
 0x163   : > { %v1256_v34 = vrot.slane %v815_v39, 2 }
 0x164   : > { %v725_v59 = vmax.f32 %v646_v42, %v659_v46  ;;  %v660_v43 = vmax.f32 %v634_v49, 0.0  ;;  %v818_v51 = vsel %vm782_vm4, %v813_v52, %v817_v53  ;;  %v821_v3 = vor.u32 %v819_v40, %v817_v53 }
 0x165   : > { %2595 = vmatmul.mubr.msk.bf16.gmra.mrb[8].mxu1 %vm850_vm5, %v818_v51  ;;  %2687 = vmatmul.mubr.msk.bf16.gmra.mrb[64].mxu0 %vm850_vm5, %v1254_v60  ;;  %v1257_v62 = vor.u32 %v1256_v34, %v1255_v58  ;;  %v1408_v40 = vrot.slane %v3297_v57, 2  ;;  %v1407_v42 = vrot.slane %v3284_v25, 2  ;;  %v1410_v49 = vrot.slane %v3317_v22, 2 }
 0x166   : > { %v3392_v61 = vpack.c.bf16 %v725_v59, %v724_v56  ;;  %v726_v55 = vmax.f32 %v647_v54, %v660_v43  ;;  %2598 = vmatprep.mubr.msk.bf16.mxu1 %vm3041_vm0, %v3040_v1  ;;  %2690 = vmatprep.mubr.msk.bf16.mxu0 %vm3041_vm0, %v3040_v1  ;;  %v1090_v56 = vrot.slane %v3317_v22, 1  ;;  %v1414_v53 = vrot.slane %v3371_v27, 2 }
 0x167   : > { %v1258_v5 = vsel %vm1239_vm6, %v1253_v33, %v1257_v62  ;;  %v1095_v33 = vsel %vm1086_vm8, %v1092_v30, %v1094_v31  ;;  %v1409_v46 = vsel %vm1406_vm9, %v1407_v42, %v1408_v40  ;;  %v1411_v52 = vsel %vm1406_vm9, %v1408_v40, %v1410_v49 }
 0x168   : > { %v765_v63 = vsel %vm700_vm7, %v726_v55, 0.0  ;;  %v823_v0 = vshll.u32 %v3392_v61, 16  ;;  %v827_v48 = vshrl.u32 %v3392_v61, 16  ;;  %v1091_v28 = vsel %vm1086_vm8, %v1088_v23, %v1090_v56 }
 0x169   : > { %v3400_v2 = vpack.c.bf16 %v765_v63, %v765_v63  ;;  %v1093_v29 = vsel %vm1086_vm8, %v1090_v56, %v1092_v30  ;;  %v1096_v32 = vrot.slane %v3392_v61, 1  ;;  %v1416_v54 = vrot.slane %v3392_v61, 2 }
 0x16a   : > { %v825_v4 = vrot.slane %v823_v0, 1  ;;  %v1259_v8 = vrot.slane %v827_v48, 1  ;;  %v1260_v9 = vrot.slane %v823_v0, 2 }
 0x16b   : > { %v831_v7 = vshll.u32 %v3400_v2, 16  ;;  %v835_v13 = vshrl.u32 %v3400_v2, 16  ;;  %v1097_v35 = vsel %vm1086_vm8, %v1094_v31, %v1096_v32  ;;  %v1098_v37 = vrot.slane %v3400_v2, 1 }
 0x16c   : > { %v826_v6 = vsel %vm782_vm4, %v821_v3, %v825_v4  ;;  %v829_v10 = vor.u32 %v827_v48, %v825_v4  ;;  %v1261_v12 = vor.u32 %v1260_v9, %v1259_v8  ;;  %v1418_v58 = vrot.slane %v3400_v2, 2 }
 0x16d   : > { %2599 = vmatmul.mubr.msk.bf16.gmra.mrb[12].mxu1 %vm850_vm5, %v826_v6  ;;  %2691 = vmatmul.mubr.msk.bf16.gmra.mrb[68].mxu0 %vm850_vm5, %v1258_v5  ;;  %v833_v11 = vrot.slane %v831_v7, 1  ;;  %v1263_v16 = vrot.slane %v835_v13, 1  ;;  %v1264_v17 = vrot.slane %v831_v7, 2  ;;  %v1099_v39 = vsel %vm1086_vm8, %v1096_v32, %v1098_v37 }
 0x16e   : > { %2602 = vmatprep.mubr.msk.bf16.mxu1 %vm3041_vm0, %v3040_v1  ;;  %2694 = vmatprep.mubr.msk.bf16.mxu0 %vm3041_vm0, %v3040_v1  ;;  %v1262_v15 = vsel %vm1239_vm6, %v1257_v62, %v1261_v12 }
 0x16f   : > { %v834_v14 = vsel %vm782_vm4, %v829_v10, %v833_v11  ;;  %v1265_v38 = vor.u32 %v1264_v17, %v1263_v16  ;;  %v837_v18 = vor.u32 %v835_v13, %v833_v11  ;;  %vm2243_vm4 = vcmask 23552  }
 0x171   : > { %v1266_v19 = vsel %vm1239_vm6, %v1261_v12, %v1265_v38 }
 0x175   : > { %2603 = vmatmul.mubr.msk.bf16.gmra.mrb[16].mxu1 %vm850_vm5, %v834_v14  ;;  %2695 = vmatmul.mubr.msk.bf16.gmra.mrb[72].mxu0 %vm850_vm5, %v1262_v15 }
 0x176   : > { %2606 = vmatprep.mubr.msk.bf16.mxu1 %vm3041_vm0, %v3040_v1  ;;  %2698 = vmatprep.mubr.msk.bf16.mxu0 %vm3041_vm0, %v3040_v1 }
 0x17d   : > { %2607 = vmatmul.mubr.msk.bf16.gmra.mrb[20].mxu1 %vm850_vm5, %v837_v18  ;;  %2699 = vmatmul.mubr.msk.bf16.gmra.mrb[76].mxu0 %vm850_vm5, %v1266_v19 }
 0x17e   : > { %2614 = vmatprep.mubr.msk.bf16.mxu1 %vm3041_vm0, %v3040_v1  ;;  %2702 = vmatprep.mubr.msk.bf16.mxu0 %vm3041_vm0, %v3040_v1 }
 0x185   : > { %2615 = vmatmul.mubr.msk.bf16.vlgmr.msra.gmra.mrb[24].mxu1 %vm850_vm5, %v3284_v25  ;;  %2703 = vmatmul.mubr.msk.bf16.gmra.mrb[80].mxu0 %vm850_vm5, %v1265_v38 }
 0x186   : > { %2643 = vmatpush3.bf16.msra.mxu1 %v2964_v20  ;;  %2618 = vmatprep.mubr.msk.bf16.mxu1 %vm3041_vm0, %v3040_v1 }
 0x187   : > { %2644 = vmatprep.subr.bf16.mxu1 %v3040_v1 }
 0x18a   : > { %2645 = vmatpush3.bf16.msra.mxu1 %v2965_v21 }
 0x18b   : > { %2706 = vmatprep.subr.bf16.mxu1 %v3040_v1 }
 0x18d   : > { %2619 = vmatmul.mubr.msk.bf16.gmra.mrb[28].mxu1 %vm850_vm5, %v3297_v57  ;;  %v1412_v57 = vrot.slane %v3344_v36, 2 }
 0x18e   : > { %2622 = vmatprep.mubr.msk.bf16.mxu1 %vm3041_vm0, %v3040_v1 }
 0x18f   : > { %v1413_v25 = vsel %vm1406_vm9, %v1410_v49, %v1412_v57 }
 0x195   : > { %2623 = vmatmul.mubr.msk.bf16.gmra.mrb[32].mxu1 %vm850_vm5, %v3317_v22  ;;  %v1415_v22 = vsel %vm1406_vm9, %v1412_v57, %v1414_v53 }
 0x196   : > { %2626 = vmatprep.mubr.msk.bf16.mxu1 %vm3041_vm0, %v3040_v1 }
 0x19d   : > { %2627 = vmatmul.mubr.msk.bf16.gmra.mrb[36].mxu1 %vm850_vm5, %v3344_v36  ;;  %v1417_v36 = vsel %vm1406_vm9, %v1414_v53, %v1416_v54 }
 0x19e   : > { %2630 = vmatprep.mubr.msk.bf16.mxu1 %vm3041_vm0, %v3040_v1 }
 0x1a5   : > { %2631 = vmatmul.mubr.msk.bf16.gmra.mrb[40].mxu1 %vm850_vm5, %v3371_v27  ;;  %v1419_v27 = vsel %vm1406_vm9, %v1416_v54, %v1418_v58 }
 0x1a6   : > { %2634 = vmatprep.mubr.msk.bf16.mxu1 %vm3041_vm0, %v3040_v1 }
 0x1ad   : > { %2635 = vmatmul.mubr.msk.bf16.gmra.mrb[44].mxu1 %vm850_vm5, %v3392_v61 }
 0x1ae   : > { %2638 = vmatprep.mubr.msk.bf16.mxu1 %vm3041_vm0, %v3040_v1 }
 0x1b5   : > { %2639 = vmatmul.mubr.msk.bf16.gmra.mrb[48].mxu1 %vm850_vm5, %v3400_v2 }
 0x1b6   : > { %2646 = vmatprep.mubr.msk.bf16.mxu1 %vm3041_vm0, %v3040_v1 }
 0x1bd   : > { %2647 = vmatmul.mubr.msk.bf16.vlgmr.msra.gmra.mrb[52].mxu1 %vm850_vm5, %v1089_v41 }
 0x1be   : > { %2707 = vmatpush3.bf16.msra.mxu1 %v2966_v50  ;;  %2650 = vmatprep.mubr.msk.bf16.mxu1 %vm3041_vm0, %v3040_v1 }
 0x1bf   : > { %2708 = vmatprep.subr.bf16.mxu1 %v3040_v1 }
 0x1c2   : > { %2709 = vmatpush3.bf16.msra.mxu1 %v2967_v26 }
 0x1c5   : > { %2651 = vmatmul.mubr.msk.bf16.gmra.mrb[56].mxu1 %vm850_vm5, %v1091_v28 }
 0x1c6   : > { %2654 = vmatprep.mubr.msk.bf16.mxu1 %vm3041_vm0, %v3040_v1 }
 0x1cd   : > { %2655 = vmatmul.mubr.msk.bf16.gmra.mrb[60].mxu1 %vm850_vm5, %v1093_v29 }
 0x1ce   : > { %2658 = vmatprep.mubr.msk.bf16.mxu1 %vm3041_vm0, %v3040_v1 }
 0x1d5   : > { %2659 = vmatmul.mubr.msk.bf16.gmra.mrb[64].mxu1 %vm850_vm5, %v1095_v33 }
 0x1d6   : > { %2662 = vmatprep.mubr.msk.bf16.mxu1 %vm3041_vm0, %v3040_v1 }
 0x1dd   : > { %2663 = vmatmul.mubr.msk.bf16.gmra.mrb[68].mxu1 %vm850_vm5, %v1097_v35 }
 0x1de   : > { %2666 = vmatprep.mubr.msk.bf16.mxu1 %vm3041_vm0, %v3040_v1 }
 0x1e5   : > { %2667 = vmatmul.mubr.msk.bf16.gmra.mrb[72].mxu1 %vm850_vm5, %v1099_v39 }
 0x1e6   : > { %2670 = vmatprep.mubr.msk.bf16.mxu1 %vm3041_vm0, %v3040_v1 }
 0x1ed   : > { %2671 = vmatmul.mubr.msk.bf16.gmra.mrb[76].mxu1 %vm850_vm5, %v1098_v37 }
 0x1ee   : > { %2710 = vmatprep.mubr.msk.bf16.mxu1 %vm3041_vm0, %v3040_v1 }
 0x1f5   : > { %2711 = vmatmul.mubr.msk.bf16.vlgmr.msra.gmra.mrb[80].mxu1 %vm850_vm5, %v1409_v46 }
 0x1f6   : > { %2714 = vmatprep.mubr.msk.bf16.mxu1 %vm3041_vm0, %v3040_v1 }
 0x1fd   : > { %2715 = vmatmul.mubr.msk.bf16.gmra.mrb[84].mxu1 %vm850_vm5, %v1411_v52 }
 0x1fe   : > { %2718 = vmatprep.mubr.msk.bf16.mxu1 %vm3041_vm0, %v3040_v1 }
 0x205   : > { %2719 = vmatmul.mubr.msk.bf16.gmra.mrb[88].mxu1 %vm850_vm5, %v1413_v25 }
 0x206   : > { %2722 = vmatprep.mubr.msk.bf16.mxu1 %vm3041_vm0, %v3040_v1 }
 0x20d   : > { %2723 = vmatmul.mubr.msk.bf16.gmra.mrb[92].mxu1 %vm850_vm5, %v1415_v22 }
 0x20e   : > { %2726 = vmatprep.mubr.msk.bf16.mxu1 %vm3041_vm0, %v3040_v1 }
 0x215   : > { %2727 = vmatmul.mubr.msk.bf16.gmra.mrb[96].mxu1 %vm850_vm5, %v1417_v36 }
 0x216   : > { %2730 = vmatprep.mubr.msk.bf16.mxu1 %vm3041_vm0, %v3040_v1 }
 0x21d   : > { %2731 = vmatmul.mubr.msk.bf16.gmra.mrb[100].mxu1 %vm850_vm5, %v1419_v27 }
 0x21e   : > { %2734 = vmatprep.mubr.msk.bf16.mxu1 %vm3041_vm0, %v3040_v1  ;;  %vm1945_vm0 = vcmask 490496  }
 0x220   : > { %v906_v34 = vpop.f32.mrb[52].mxu0 }
 0x221   : > { %v2584_v59 = vpop.f32.mrb[53].mxu0 }
 0x222   : > { %v909_v43 = vpop.f32.mrb[54].mxu0 }
 0x223   : > { %v2585_v51 = vpop.f32.mrb[55].mxu0 }
 0x225   : > { %2735 = vmatmul.mubr.msk.bf16.gmra.mrb[104].mxu1 %vm850_vm5, %v1418_v58 }
 0x228   : > { %v914_v60 = vpop.f32.mrb[0].mxu1  ;;  %v3537_v61 = vpop.f32.mrb[56].mxu0 }
 0x229   : > { %v2588_v55 = vpop.f32.mrb[1].mxu1  ;;  %v2680_v62 = vpop.f32.mrb[57].mxu0 }
 0x22a   : > { %v917_v63 = vpop.f32.mrb[2].mxu1  ;;  %v3539_v0 = vpop.f32.mrb[58].mxu0 }
 0x22b   : > { %v2589_v48 = vpop.f32.mrb[3].mxu1  ;;  %v2681_v2 = vpop.f32.mrb[59].mxu0 }
 0x230   : > { %v922_v3 = vpop.f32.mrb[4].mxu1  ;;  %v3541_v4 = vpop.f32.mrb[60].mxu0 }
 0x231   : > { %v2592_v1 = vpop.f32.mrb[5].mxu1  ;;  %v2684_v5 = vpop.f32.mrb[61].mxu0 }
 0x232   : > { %v925_v6 = vpop.f32.mrb[6].mxu1  ;;  %v3543_v7 = vpop.f32.mrb[62].mxu0 }
 0x233   : > { %v2593_v8 = vpop.f32.mrb[7].mxu1  ;;  %v2685_v9 = vpop.f32.mrb[63].mxu0 }
 0x238   : > { %v930_v10 = vpop.f32.mrb[8].mxu1  ;;  %v3545_v11 = vpop.f32.mrb[64].mxu0 }
 0x239   : > { %v2596_v12 = vpop.f32.mrb[9].mxu1  ;;  %v2688_v13 = vpop.f32.mrb[65].mxu0 }
 0x23a   : > { %v933_v14 = vpop.f32.mrb[10].mxu1  ;;  %v3547_v15 = vpop.f32.mrb[66].mxu0 }
 0x23b   : > { %v2597_v16 = vpop.f32.mrb[11].mxu1  ;;  %v2689_v17 = vpop.f32.mrb[67].mxu0 }
 0x240   : > { %v938_v38 = vpop.f32.mrb[12].mxu1  ;;  %v3549_v18 = vpop.f32.mrb[68].mxu0 }
 0x241   : > { %v2600_v19 = vpop.f32.mrb[13].mxu1  ;;  %v2692_v20 = vpop.f32.mrb[69].mxu0 }
 0x242   : > { %v941_v21 = vpop.f32.mrb[14].mxu1  ;;  %v3551_v23 = vpop.f32.mrb[70].mxu0 }
 0x243   : > { %v2601_v24 = vpop.f32.mrb[15].mxu1  ;;  %v2693_v50 = vpop.f32.mrb[71].mxu0 }
 0x248   : > { %v946_v41 = vpop.f32.mrb[16].mxu1  ;;  %v3553_v26 = vpop.f32.mrb[72].mxu0 }
 0x249   : > { %v2604_v56 = vpop.f32.mrb[17].mxu1  ;;  %v2696_v28 = vpop.f32.mrb[73].mxu0 }
 0x24a   : > { %v949_v30 = vpop.f32.mrb[18].mxu1  ;;  %v3555_v29 = vpop.f32.mrb[74].mxu0 }
 0x24b   : > { %v2605_v31 = vpop.f32.mrb[19].mxu1  ;;  %v2697_v33 = vpop.f32.mrb[75].mxu0 }
 0x250   : > { %v954_v32 = vpop.f32.mrb[20].mxu1  ;;  %v3557_v35 = vpop.f32.mrb[76].mxu0 }
 0x251   : > { %v2608_v37 = vpop.f32.mrb[21].mxu1  ;;  %v2700_v39 = vpop.f32.mrb[77].mxu0 }
 0x252   : > { %v957_v40 = vpop.f32.mrb[22].mxu1  ;;  %v3559_v42 = vpop.f32.mrb[78].mxu0 }
 0x253   : > { %v2609_v46 = vpop.f32.mrb[23].mxu1  ;;  %v2701_v49 = vpop.f32.mrb[79].mxu0 }
 0x258   : > { %v1020_v52 = vpop.f32.mrb[24].mxu1  ;;  %v3561_v57 = vpop.f32.mrb[80].mxu0 }
 0x259   : > { %v1021_v25 = vadd.f32 %v1020_v52, %v906_v34  ;;  %v2616_v53 = vpop.f32.mrb[25].mxu1  ;;  %v2704_v22 = vpop.f32.mrb[81].mxu0 }
 0x25a   : > { %v1023_v54 = vpop.f32.mrb[26].mxu1  ;;  %v1385_v36 = vpop.f32.mrb[82].mxu0 }
 0x25b   : > { %v1024_v58 = vadd.f32 %v1023_v54, %v909_v43  ;;  %v2617_v27 = vpop.f32.mrb[27].mxu1  ;;  %v2705_v59 = vpop.f32.mrb[83].mxu0 }
 0x260   : > { %v1028_v51 = vpop.f32.mrb[28].mxu1 }
 0x261   : > { %v1029_v55 = vadd.f32 %v1028_v51, %v914_v60  ;;  %v2620_v62 = vpop.f32.mrb[29].mxu1 }
 0x262   : > { %v1031_v48 = vpop.f32.mrb[30].mxu1 }
 0x263   : > { %v1032_v2 = vadd.f32 %v1031_v48, %v917_v63  ;;  %v2621_v1 = vpop.f32.mrb[31].mxu1 }
 0x268   : > { %v1036_v5 = vpop.f32.mrb[32].mxu1 }
 0x269   : > { %v1037_v8 = vadd.f32 %v1036_v5, %v922_v3  ;;  %v2624_v9 = vpop.f32.mrb[33].mxu1 }
 0x26a   : > { %v1039_v12 = vpop.f32.mrb[34].mxu1 }
 0x26b   : > { %v1040_v13 = vadd.f32 %v1039_v12, %v925_v6  ;;  %v2625_v16 = vpop.f32.mrb[35].mxu1 }
 0x270   : > { %v1044_v34 = vpop.f32.mrb[36].mxu1 }
 0x271   : > { %v1045_v17 = vadd.f32 %v1044_v34, %v930_v10  ;;  %v2628_v19 = vpop.f32.mrb[37].mxu1 }
 0x272   : > { %v1047_v20 = vpop.f32.mrb[38].mxu1 }
 0x273   : > { %v1048_v24 = vadd.f32 %v1047_v20, %v933_v14  ;;  %v2629_v43 = vpop.f32.mrb[39].mxu1  ;;  %v2968_v14 = vld [vmem:[%s4006_s3] sm:$0xff]  }
 0x274   : > { %2738 = vmatprep.subr.bf16.mxu0 %v2968_v14 }
 0x275   : > { %2739 = vmatpush3.bf16.msra.mxu0 %v2968_v14 }
 0x278   : > { %v1052_v50 = vpop.f32.mrb[40].mxu1 }
 0x279   : > { %v1053_v56 = vadd.f32 %v1052_v50, %v938_v38  ;;  %v2632_v28 = vpop.f32.mrb[41].mxu1  ;;  %v2969_v38 = vld [vmem:[%s4006_s3 + $0x8] sm:$0xff]  }
 0x27a   : > { %v1055_v60 = vpop.f32.mrb[42].mxu1  ;;  %2740 = vmatprep.subr.bf16.mxu0 %v2969_v38 }
 0x27b   : > { %v1056_v31 = vadd.f32 %v1055_v60, %v941_v21  ;;  %v2633_v33 = vpop.f32.mrb[43].mxu1  ;;  %2741 = vmatpush3.bf16.msra.mxu0 %v2969_v38 }
 0x280   : > { %v1060_v63 = vpop.f32.mrb[44].mxu1 }
 0x281   : > { %v1061_v37 = vadd.f32 %v1060_v63, %v946_v41  ;;  %v2636_v39 = vpop.f32.mrb[45].mxu1 }
 0x282   : > { %v1063_v3 = vpop.f32.mrb[46].mxu1 }
 0x283   : > { %v1064_v40 = vadd.f32 %v1063_v3, %v949_v30  ;;  %v2637_v46 = vpop.f32.mrb[47].mxu1 }
 0x288   : > { %v1068_v6 = vpop.f32.mrb[48].mxu1 }
 0x289   : > { %v1069_v49 = vadd.f32 %v1068_v6, %v954_v32  ;;  %v2640_v52 = vpop.f32.mrb[49].mxu1 }
 0x28a   : > { %v1071_v10 = vpop.f32.mrb[50].mxu1 }
 0x28b   : > { %v2641_v53 = vpop.f32.mrb[51].mxu1 }
 0x290   : > { %v1167_v22 = vpop.f32.mrb[52].mxu1 }
 0x291   : > { %v1221_v21 = vadd.f32 %v1167_v22, %v1021_v25  ;;  %v2648_v41 = vpop.f32.mrb[53].mxu1 }
 0x292   : > { %v1170_v54 = vpop.f32.mrb[54].mxu1 }
 0x293   : > { %v1222_v30 = vadd.f32 %v1170_v54, %v1024_v58  ;;  %v2649_v36 = vpop.f32.mrb[55].mxu1  ;;  %v1388_v32 = vadd.f32 %v3537_v61, %v1221_v21 }
 0x295   : > { %v1389_v27 = vadd.f32 %v3539_v0, %v1222_v30 }
 0x298   : > { %v1175_v59 = vpop.f32.mrb[56].mxu1 }
 0x299   : > { %v1223_v51 = vadd.f32 %v1175_v59, %v1029_v55  ;;  %v2652_v62 = vpop.f32.mrb[57].mxu1 }
 0x29a   : > { %v1178_v48 = vpop.f32.mrb[58].mxu1 }
 0x29b   : > { %v1224_v1 = vadd.f32 %v1178_v48, %v1032_v2  ;;  %v2653_v5 = vpop.f32.mrb[59].mxu1  ;;  %v1390_v25 = vadd.f32 %v3541_v4, %v1223_v51 }
 0x29d   : > { %v1391_v9 = vadd.f32 %v3543_v7, %v1224_v1 }
 0x2a0   : > { %v1183_v12 = vpop.f32.mrb[60].mxu1 }
 0x2a1   : > { %v1225_v58 = vadd.f32 %v1183_v12, %v1037_v8  ;;  %v2656_v16 = vpop.f32.mrb[61].mxu1 }
 0x2a2   : > { %v1186_v34 = vpop.f32.mrb[62].mxu1 }
 0x2a3   : > { %v1226_v61 = vadd.f32 %v1186_v34, %v1040_v13  ;;  %v2657_v19 = vpop.f32.mrb[63].mxu1  ;;  %v3574_v20 = vadd.f32 %v3545_v11, %v1225_v58 }
 0x2a5   : > { %v3577_v0 = vadd.f32 %v3547_v15, %v1226_v61  ;;  %v2971_v61 = vld [vmem:[%s4006_s3 + $0x18] sm:$0xff]  }
 0x2a8   : > { %v1191_v55 = vpop.f32.mrb[64].mxu1 }
 0x2a9   : > { %v1227_v43 = vadd.f32 %v1191_v55, %v1045_v17  ;;  %v2660_v2 = vpop.f32.mrb[65].mxu1 }
 0x2aa   : > { %v1194_v50 = vpop.f32.mrb[66].mxu1 }
 0x2ab   : > { %v1228_v28 = vadd.f32 %v1194_v50, %v1048_v24  ;;  %v2661_v4 = vpop.f32.mrb[67].mxu1  ;;  %v3580_v7 = vadd.f32 %v3549_v18, %v1227_v43 }
 0x2ad   : > { %v3583_v8 = vadd.f32 %v3551_v23, %v1228_v28 }
 0x2b0   : > { %v1199_v13 = vpop.f32.mrb[68].mxu1 }
 0x2b1   : > { %v1229_v60 = vadd.f32 %v1199_v13, %v1053_v56  ;;  %v2664_v33 = vpop.f32.mrb[69].mxu1 }
 0x2b2   : > { %v1202_v11 = vpop.f32.mrb[70].mxu1 }
 0x2b3   : > { %v1230_v63 = vadd.f32 %v1202_v11, %v1056_v31  ;;  %v2665_v39 = vpop.f32.mrb[71].mxu1  ;;  %v3586_v15 = vadd.f32 %v3553_v26, %v1229_v60 }
 0x2b4   : > { %v2972_v39 = vld [vmem:[%s4006_s3 + $0x20] sm:$0xff]  }
 0x2b5   : > { %v3589_v17 = vadd.f32 %v3555_v29, %v1230_v63  ;;  %v1595_v29 = vsub.s32 2, %v3247_v44 }
 0x2b8   : > { %v1207_v24 = vpop.f32.mrb[72].mxu1 }
 0x2b9   : > { %v1231_v3 = vadd.f32 %v1207_v24, %v1061_v37  ;;  %v2668_v46 = vpop.f32.mrb[73].mxu1  ;;  %v3602_v37 = vrot.slane %v3253_v47, %v1595_v29 }
 0x2ba   : > { %v1210_v18 = vpop.f32.mrb[74].mxu1 }
 0x2bb   : > { %v1232_v6 = vadd.f32 %v1210_v18, %v1064_v40  ;;  %v2669_v52 = vpop.f32.mrb[75].mxu1  ;;  %v3592_v23 = vadd.f32 %v3557_v35, %v1231_v3 }
 0x2bd   : > { %v3595_v56 = vadd.f32 %v3559_v42, %v1232_v6 }
 0x2c0   : > { %v1215_v31 = vpop.f32.mrb[76].mxu1 }
 0x2c1   : > { %v1233_v10 = vadd.f32 %v1215_v31, %v1069_v49  ;;  %v2672_v53 = vpop.f32.mrb[77].mxu1 }
 0x2c2   : > { %v1218_v26 = vpop.f32.mrb[78].mxu1 }
 0x2c3   : > { %v2673_v22 = vpop.f32.mrb[79].mxu1  ;;  %v3599_v14 = vadd.f32 %v3561_v57, %v1233_v10 }
 0x2c8   : > { %v1487_v40 = vpop.f32.mrb[80].mxu1 }
 0x2c9   : > { %v1541_v38 = vadd.f32 %v1487_v40, %v1388_v32  ;;  %v2712_v35 = vpop.f32.mrb[81].mxu1  ;;  %v2970_v32 = vld [vmem:[%s4006_s3 + $0x10] sm:$0xff]   ;;  %v2973_v40 = vld [vmem:[%s4006_s3 + $0x28] sm:$0xff]  }
 0x2ca   : > { %v1490_v21 = vpop.f32.mrb[82].mxu1  ;;  %2742 = vmatprep.subr.bf16.mxu0 %v2970_v32 }
 0x2cb   : > { %v1597_v42 = vadd.f32 %v3602_v37, %v1541_v38  ;;  %v1542_v41 = vadd.f32 %v1490_v21, %v1389_v27  ;;  %v2713_v54 = vpop.f32.mrb[83].mxu1  ;;  %2743 = vmatpush3.bf16.msra.mxu0 %v2970_v32 }
 0x2cc   : > { %2744 = vmatprep.subr.bf16.mxu0 %v2971_v61 }
 0x2cd   : > { %v1610_v49 = vmax.f32 %v1597_v42, 0.0  ;;  %v1598_v30 = vadd.f32 %v3602_v37, %v1542_v41 }
 0x2cf   : > { %v3607_v36 = vmax.f32 %v1598_v30, 0.0  ;;  %v3609_v59 = vsel %vm1554_vm10, %v1610_v49, 0.0  ;;  %2745 = vmatpush3.bf16.msra.mxu0 %v2971_v61 }
 0x2d0   : > { %v1495_v57 = vpop.f32.mrb[84].mxu1  ;;  %v1735_v5 = vrot.slane %v3609_v59, 2  ;;  %v1675_v58 = vrot.slane %v3609_v59, 1  ;;  %v1796_v28 = vrot.slane %v3609_v59, 3  ;;  %2746 = vmatprep.subr.bf16.mxu0 %v2972_v39  ;;  %v1858_v10 = vrot.slane %v3609_v59, 4 }
 0x2d1   : > { %v1543_v47 = vadd.f32 %v1495_v57, %v1390_v25  ;;  %v2716_v51 = vpop.f32.mrb[85].mxu1  ;;  %v1736_v12 = vrot.slane %v3607_v36, 2  ;;  %v1676_v16 = vrot.slane %v3607_v36, 1  ;;  %v1797_v4 = vrot.slane %v3607_v36, 3 }
 0x2d2   : > { %v1498_v62 = vpop.f32.mrb[86].mxu1  ;;  %v1859_v53 = vrot.slane %v3607_v36, 4 }
 0x2d3   : > { %v1599_v27 = vadd.f32 %v3602_v37, %v1543_v47  ;;  %v1544_v48 = vadd.f32 %v1498_v62, %v1391_v9  ;;  %v2717_v1 = vpop.f32.mrb[87].mxu1  ;;  %v1737_v2 = vsel %vm1406_vm9, %v1735_v5, %v1736_v12  ;;  %v1677_v50 = vsel %vm1086_vm8, %v1675_v58, %v1676_v16  ;;  %2747 = vmatpush3.bf16.msra.mxu0 %v2972_v39 }
 0x2d4   : > { %v1798_v22 = vsel %vm1795_vm11, %v1796_v28, %v1797_v4  ;;  %2748 = vmatprep.subr.bf16.mxu0 %v2973_v40  ;;  %v1860_v49 = vsel %vm1857_vm12, %v1858_v10, %v1859_v53 }
 0x2d5   : > { %v3619_v25 = vmax.f32 %v1599_v27, 0.0  ;;  %v1600_v34 = vadd.f32 %v3602_v37, %v1544_v48  ;;  %v2974_v48 = vld [vmem:[%s4006_s3 + $0x30] ss:$0 sps:$4 sm:$0x33]  }
 0x2d7   : > { %v1738_v9 = vrot.slane %v3619_v25, 2  ;;  %v1678_v19 = vrot.slane %v3619_v25, 1  ;;  %v1799_v55 = vrot.slane %v3619_v25, 3  ;;  %v3632_v13 = vmax.f32 %v1600_v34, 0.0  ;;  %2749 = vmatpush3.bf16.msra.mxu0 %v2973_v40 }
 0x2d8   : > { %v1503_v43 = vpop.f32.mrb[88].mxu1  ;;  %v1861_v31 = vrot.slane %v3619_v25, 4  ;;  %2768 = vmatprep.subr.msk.bf16.mxu0 %vm434_vm1, %v2974_v48 }
 0x2d9   : > { %v1545_v60 = vadd.f32 %v1503_v43, %v3574_v20  ;;  %v2720_v33 = vpop.f32.mrb[89].mxu1  ;;  %v1739_v11 = vsel %vm1406_vm9, %v1736_v12, %v1738_v9  ;;  %v1679_v63 = vsel %vm1086_vm8, %v1676_v16, %v1678_v19  ;;  %v1800_v52 = vsel %vm1795_vm11, %v1797_v4, %v1799_v55 }
 0x2da   : > { %v1506_v24 = vpop.f32.mrb[90].mxu1  ;;  %v2823_v3 = vpack.i.bf16 %v1739_v11, %v1737_v2  ;;  %v2818_v46 = vpack.i.bf16 %v1679_v63, %v1677_v50  ;;  %v1740_v29 = vrot.slane %v3632_v13, 2  ;;  %v2828_v38 = vpack.i.bf16 %v1800_v52, %v1798_v22 }
 0x2db   : > { %v1601_v18 = vadd.f32 %v3602_v37, %v1545_v60  ;;  %v1546_v6 = vadd.f32 %v1506_v24, %v3577_v0  ;;  %v2721_v20 = vpop.f32.mrb[91].mxu1  ;;  %v1862_v35 = vsel %vm1857_vm12, %v1859_v53, %v1861_v31  ;;  %v1801_v30 = vrot.slane %v3632_v13, 3 }
 0x2dc   : > { %2824 = vrot.lane.b32.xlu1 %v2823_v3, %s3042_s15  ;;  %2819 = vrot.lane.b32.xlu0 %v2818_v46, %s3043_s16  ;;  %v1680_v57 = vrot.slane %v3632_v13, 1  ;;  %v1741_v62 = vsel %vm1406_vm9, %v1738_v9, %v1740_v29  ;;  %v2833_v5 = vpack.i.bf16 %v1862_v35, %v1860_v49  ;;  %v2048_v2 = vsel %vm434_vm1, %v2974_v48, 0 }
 0x2dd   : > { %v3652_v0 = vmax.f32 %v1601_v18, 0.0  ;;  %v1602_v26 = vadd.f32 %v3602_v37, %v1546_v6  ;;  %v1802_v43 = vsel %vm1795_vm11, %v1799_v55, %v1801_v30  ;;  %2751 = vmatpush3.bf16.msra.mxu0 %v2048_v2  ;;  %vm1958_vm1 = vcmask 654336  }
 0x2de   : > { %v1681_v4 = vsel %vm1086_vm8, %v1678_v19, %v1680_v57 }
 0x2df   : > { %v1742_v21 = vrot.slane %v3652_v0, 2  ;;  %v1803_v42 = vrot.slane %v3652_v0, 3  ;;  %v1682_v41 = vrot.slane %v3652_v0, 1  ;;  %v3670_v47 = vmax.f32 %v1602_v26, 0.0 }
 0x2e0   : > { %v1511_v54 = vpop.f32.mrb[92].mxu1  ;;  %2829 = vrot.lane.b32.xlu0 %v2828_v38, %s3044_s19  ;;  %v1865_v58 = vrot.slane %v3652_v0, 4 }
 0x2e1   : > { %v1547_v51 = vadd.f32 %v1511_v54, %v3580_v7  ;;  %v2724_v32 = vpop.f32.mrb[93].mxu1  ;;  %v1743_v27 = vsel %vm1406_vm9, %v1740_v29, %v1742_v21  ;;  %v1804_v61 = vsel %vm1795_vm11, %v1801_v30, %v1803_v42  ;;  %v1683_v9 = vsel %vm1086_vm8, %v1680_v57, %v1682_v41 }
 0x2e2   : > { %v1514_v1 = vpop.f32.mrb[94].mxu1  ;;  %v2843_v12 = vpack.i.bf16 %v1743_v27, %v1741_v62  ;;  %v1684_v60 = vrot.slane %v3670_v47, 1  ;;  %v2848_v33 = vpack.i.bf16 %v1804_v61, %v1802_v43  ;;  %v2838_v11 = vpack.i.bf16 %v1683_v9, %v1681_v4 }
 0x2e3   : > { %v1603_v16 = vadd.f32 %v3602_v37, %v1547_v51  ;;  %v1548_v7 = vadd.f32 %v1514_v1, %v3583_v8  ;;  %v2725_v34 = vpop.f32.mrb[95].mxu1  ;;  %v1863_v8 = vrot.slane %v3632_v13, 4  ;;  %v1744_v3 = vrot.slane %v3670_v47, 2 }
 0x2e4   : > { %2834 = vrot.lane.b32.xlu0 %v2833_v5, %s3045_s28  ;;  %2844 = vrot.lane.b32.xlu1 %v2843_v12, %s3042_s15  ;;  %v1685_v20 = vsel %vm1086_vm8, %v1682_v41, %v1684_v60 }
 0x2e5   : > { %v3695_v50 = vmax.f32 %v1603_v16, 0.0  ;;  %v1604_v28 = vadd.f32 %v3602_v37, %v1548_v7  ;;  %v1866_v55 = vsel %vm1857_vm12, %v1863_v8, %v1865_v58  ;;  %v1864_v19 = vsel %vm1857_vm12, %v1861_v31, %v1863_v8 }
 0x2e6   : > { %v2853_v53 = vpack.i.bf16 %v1866_v55, %v1864_v19  ;;  %v1745_v54 = vsel %vm1406_vm9, %v1742_v21, %v1744_v3  ;;  %v1867_v21 = vrot.slane %v3670_v47, 4 }
 0x2e7   : > { %v1686_v63 = vrot.slane %v3695_v50, 1  ;;  %v1746_v39 = vrot.slane %v3695_v50, 2  ;;  %v3713_v46 = vmax.f32 %v1604_v28, 0.0  ;;  %v1807_v38 = vrot.slane %v3695_v50, 3 }
 0x2e8   : > { %v1519_v24 = vpop.f32.mrb[96].mxu1  ;;  %2849 = vrot.lane.b32.xlu1 %v2848_v33, %s3044_s19  ;;  %2839 = vrot.lane.b32.xlu0 %v2838_v11, %s3043_s16  ;;  %v1869_v30 = vrot.slane %v3695_v50, 4 }
 0x2e9   : > { %v1549_v18 = vadd.f32 %v1519_v24, %v3586_v15  ;;  %v2728_v6 = vpop.f32.mrb[97].mxu1  ;;  %v1687_v52 = vsel %vm1086_vm8, %v1684_v60, %v1686_v63  ;;  %v1747_v31 = vsel %vm1406_vm9, %v1744_v3, %v1746_v39  ;;  %v1805_v15 = vrot.slane %v3670_v47, 3 }
 0x2ea   : > { %v1522_v10 = vpop.f32.mrb[98].mxu1  ;;  %v2858_v26 = vpack.i.bf16 %v1687_v52, %v1685_v20  ;;  %v2863_v49 = vpack.i.bf16 %v1747_v31, %v1745_v54  ;;  %v1748_v48 = vrot.slane %v3713_v46, 2  ;;  %v1870_v43 = vsel %vm1857_vm12, %v1867_v21, %v1869_v30 }
 0x2eb   : > { %v1605_v22 = vadd.f32 %v3602_v37, %v1549_v18  ;;  %v1550_v29 = vadd.f32 %v1522_v10, %v3589_v17  ;;  %v2729_v40 = vpop.f32.mrb[99].mxu1  ;;  %v1688_v17 = vrot.slane %v3713_v46, 1  ;;  %v1808_v57 = vsel %vm1795_vm11, %v1805_v15, %v1807_v38 }
 0x2ec   : > { %2854 = vrot.lane.b32.xlu1 %v2853_v53, %s3045_s28  ;;  %2859 = vrot.lane.b32.xlu0 %v2858_v26, %s3043_s16  ;;  %v1806_v27 = vsel %vm1795_vm11, %v1803_v42, %v1805_v15  ;;  %v1809_v60 = vrot.slane %v3713_v46, 3  ;;  %v1871_v52 = vrot.slane %v3713_v46, 4 }
 0x2ed   : > { %v3725_v35 = vmax.f32 %v1605_v22, 0.0  ;;  %v1606_v41 = vadd.f32 %v3602_v37, %v1550_v29  ;;  %v1689_v16 = vsel %vm1086_vm8, %v1686_v63, %v1688_v17  ;;  %v2868_v61 = vpack.i.bf16 %v1808_v57, %v1806_v27 }
 0x2ef   : > { %v1690_v51 = vrot.slane %v3725_v35, 1  ;;  %v1750_v32 = vrot.slane %v3725_v35, 2  ;;  %v3742_v1 = vmax.f32 %v1606_v41, 0.0  ;;  %v1811_v4 = vrot.slane %v3725_v35, 3 }
 0x2f0   : > { %v1527_v62 = vpop.f32.mrb[100].mxu1  ;;  %2864 = vrot.lane.b32.xlu0 %v2863_v49, %s3042_s15  ;;  %v1873_v19 = vrot.slane %v3725_v35, 4 }
 0x2f1   : > { %v1551_v5 = vadd.f32 %v1527_v62, %v3592_v23  ;;  %v2732_v12 = vpop.f32.mrb[101].mxu1  ;;  %v1691_v7 = vsel %vm1086_vm8, %v1688_v17, %v1690_v51  ;;  %v1751_v28 = vsel %vm1406_vm9, %v1748_v48, %v1750_v32  ;;  %v1868_v23 = vsel %vm1857_vm12, %v1865_v58, %v1867_v21 }
 0x2f2   : > { %v1530_v34 = vpop.f32.mrb[102].mxu1  ;;  %v2878_v9 = vpack.i.bf16 %v1691_v7, %v1689_v16  ;;  %v1692_v55 = vrot.slane %v3742_v1, 1  ;;  %v2873_v63 = vpack.i.bf16 %v1870_v43, %v1868_v23  ;;  %v1812_v18 = vsel %vm1795_vm11, %v1809_v60, %v1811_v4 }
 0x2f3   : > { %v1607_v42 = vadd.f32 %v3602_v37, %v1551_v5  ;;  %v1552_v8 = vadd.f32 %v1530_v34, %v3595_v56  ;;  %v2733_v2 = vpop.f32.mrb[103].mxu1  ;;  %v1749_v56 = vsel %vm1406_vm9, %v1746_v39, %v1748_v48  ;;  %v1810_v39 = vsel %vm1795_vm11, %v1807_v38, %v1809_v60 }
 0x2f4   : > { %2869 = vrot.lane.b32.xlu0 %v2868_v61, %s3044_s19  ;;  %2879 = vrot.lane.b32.xlu1 %v2878_v9, %s3043_s16  ;;  %v2883_v24 = vpack.i.bf16 %v1751_v28, %v1749_v56  ;;  %v1693_v26 = vsel %vm1086_vm8, %v1690_v51, %v1692_v55  ;;  %v1752_v29 = vrot.slane %v3742_v1, 2  ;;  %v2888_v31 = vpack.i.bf16 %v1812_v18, %v1810_v39 }
 0x2f5   : > { %v3758_v33 = vmax.f32 %v1607_v42, 0.0  ;;  %v1608_v11 = vadd.f32 %v3602_v37, %v1552_v8  ;;  %v1874_v41 = vsel %vm1857_vm12, %v1871_v52, %v1873_v19  ;;  %v1872_v51 = vsel %vm1857_vm12, %v1869_v30, %v1871_v52 }
 0x2f6   : > { %v1753_v62 = vsel %vm1406_vm9, %v1750_v32, %v1752_v29  ;;  %v2893_v27 = vpack.i.bf16 %v1874_v41, %v1872_v51  ;;  %v1875_v32 = vrot.slane %v3742_v1, 4 }
 0x2f7   : > { %v3764_v3 = vmax.f32 %v1608_v11, 0.0  ;;  %v1694_v58 = vrot.slane %v3758_v33, 1  ;;  %v1754_v6 = vrot.slane %v3758_v33, 2  ;;  %v1815_v49 = vrot.slane %v3758_v33, 3 }
 0x2f8   : > { %v1535_v20 = vpop.f32.mrb[104].mxu1  ;;  %2874 = vrot.lane.b32.xlu0 %v2873_v63, %s3045_s28  ;;  %2884 = vrot.lane.b32.xlu1 %v2883_v24, %s3042_s15  ;;  %v1877_v12 = vrot.slane %v3758_v33, 4  ;;  %v1876_v42 = vsel %vm1857_vm12, %v1873_v19, %v1875_v32 }
 0x2f9   : > { %v1553_v10 = vadd.f32 %v1535_v20, %v3599_v14  ;;  %v2736_v53 = vpop.f32.mrb[105].mxu1  ;;  %v1695_v22 = vsel %vm1086_vm8, %v1692_v55, %v1694_v58  ;;  %v1755_v38 = vsel %vm1406_vm9, %v1752_v29, %v1754_v6  ;;  %v1696_v14 = vrot.slane %v3764_v3, 1 }
 0x2fa   : > { %v1538_v40 = vpop.f32.mrb[106].mxu1  ;;  %v2898_v15 = vpack.i.bf16 %v1695_v22, %v1693_v26  ;;  %v2903_v21 = vpack.i.bf16 %v1755_v38, %v1753_v62  ;;  %v1756_v45 = vrot.slane %v3764_v3, 2  ;;  %v1878_v9 = vsel %vm1857_vm12, %v1875_v32, %v1877_v12 }
 0x2fb   : > { %v1609_v54 = vadd.f32 %v3602_v37, %v1553_v10  ;;  %v2737_v17 = vpop.f32.mrb[107].mxu1  ;;  %v1813_v37 = vrot.slane %v3742_v1, 3  ;;  %v1697_v5 = vsel %vm1086_vm8, %v1694_v58, %v1696_v14  ;;  %v1817_v8 = vrot.slane %v3764_v3, 3 }
 0x2fc   : > { %2889 = vrot.lane.b32.xlu1 %v2888_v31, %s3044_s19  ;;  %2899 = vrot.lane.b32.xlu0 %v2898_v15, %s3043_s16  ;;  %v2918_v34 = vpack.i.bf16 %v1696_v14, %v1697_v5  ;;  %v1757_v43 = vsel %vm1406_vm9, %v1754_v6, %v1756_v45  ;;  %v2913_v2 = vpack.i.bf16 %v1878_v9, %v1876_v42  ;;  %v1879_v11 = vrot.slane %v3764_v3, 4 }
 0x2fd   : > { %v1622_v57 = vmax.f32 %v1609_v54, 0.0  ;;  %v1816_v48 = vsel %vm1795_vm11, %v1813_v37, %v1815_v49  ;;  %v1814_v30 = vsel %vm1795_vm11, %v1811_v4, %v1813_v37  ;;  %v2923_v28 = vpack.i.bf16 %v1756_v45, %v1757_v43 }
 0x2fe   : > { %v2908_v7 = vpack.i.bf16 %v1816_v48, %v1814_v30  ;;  %v1818_v60 = vsel %vm1795_vm11, %v1815_v49, %v1817_v8  ;;  %v1880_v63 = vsel %vm1857_vm12, %v1877_v12, %v1879_v11 }
 0x2ff   : > { %v1661_v16 = vsel %vm1579_vm13, %v1622_v57, 0.0 }
 0x300   : > { %2894 = vrot.lane.b32.xlu1 %v2893_v27, %s3045_s28  ;;  %2904 = vrot.lane.b32.xlu0 %v2903_v21, %s3042_s15  ;;  %v1819_v61 = vrot.slane %v1661_v16, 3  ;;  %v1881_v4 = vrot.slane %v1661_v16, 4 }
 0x302   : > { %v1820_v23 = vsel %vm1795_vm11, %v1817_v8, %v1819_v61  ;;  %v1882_v55 = vsel %vm1857_vm12, %v1879_v11, %v1881_v4 }
 0x303   : > { %v2928_v56 = vpack.i.bf16 %v1820_v23, %v1818_v60  ;;  %v2933_v24 = vpack.i.bf16 %v1882_v55, %v1880_v63 }
 0x304   : > { %2909 = vrot.lane.b32.xlu0 %v2908_v7, %s3044_s19  ;;  %2919 = vrot.lane.b32.xlu1 %v2918_v34, %s3043_s16  ;;  %s2980_s16 = sshll.u32 %s3049_s25, 4  ;;  %s2981_s16 = int_to_ptr.vmem [resolvable:$false] %s2980_s16 }
 0x305   : > { %s2982_s17 = scalar_lea.vmem %s2981_s16, 32 }
 0x308   : > { %2914 = vrot.lane.b32.xlu0 %v2913_v2, %s3045_s28  ;;  %2924 = vrot.lane.b32.xlu1 %v2923_v28, %s3042_s15 }
 0x30c   : > { %2929 = vrot.lane.b32.xlu1 %v2928_v56, %s3044_s19  ;;  %s3046_s19 = smov 64  }
 0x310   : > { %2934 = vrot.lane.b32.xlu1 %v2933_v24, %s3045_s28  ;;  %s242_s28 = sand.u32 1, %s3030_s22  }
 0x311   : > { %s243_s9 = scalar_lea.vmem [#allocation2], %s242_s28  ;;  %s2252_s14 = scalar_lea.sflag [#allocation3], %s242_s28 }
 0x312   : > { %s2264_s10 = sshll.u32 %s243_s9, 4  ;;  %s3963_s10 = int_to_ptr.vmem [resolvable:$true] %s2264_s10 }
 0x313   : > { %s2976_s15 = scalar_lea.vmem %s3963_s10, 16  ;;  %p2983_p0 = scmp.lt.s32.totalorder %s3963_s10, %s2981_s16 }
 0x314   : > { %p2977_p11 = scmp.ne.s32.totalorder %s3963_s10, %s2976_s15  ;;  %p2984_p1 = scmp.lt.s32.totalorder %s2982_s17, %s2976_s15 }
 0x316   : > { %p2978_p12 = pnand %p2977_p11, %p3123_p5  ;;  %p2985_p2 = por %p2984_p1, %p2983_p0 }
 0x318   : > { %p2979_p13 = pneg %p2978_p12 }
 0x31a   : > { %p2986_p3 = pnand %p2985_p2, %p2979_p13 }
 0x34e   : > { %v2820_v19 = vpop.permute.xlu0 %2819  ;;  %v2825_v18 = vpop.permute.xlu1 %2824 }
 0x34f   : > { %v2822_v58 = vunpack.i.h.bf16 %v2820_v19  ;;  %v2821_v6 = vunpack.i.l.bf16 %v2820_v19  ;;  %v2827_v39 = vunpack.i.h.bf16 %v2825_v18  ;;  %v2826_v52 = vunpack.i.l.bf16 %v2825_v18 }
 0x351   : > { %v1921_v10 = vsel %vm1919_vm14, %v3607_v36, %v2822_v58  ;;  %v1920_v53 = vsel %vm1919_vm14, %v3609_v59, %v2821_v6 }
 0x352   : > { %v2830_v20 = vpop.permute.xlu0 %2829  ;;  %v1933_v31 = vsel %vm1932_vm15, %v1920_v53, %v2826_v52  ;;  %v1934_v15 = vsel %vm1932_vm15, %v1921_v10, %v2827_v39 }
 0x353   : > { %v2832_v26 = vunpack.i.h.bf16 %v2830_v20  ;;  %v2831_v22 = vunpack.i.l.bf16 %v2830_v20 }
 0x355   : > { %v1946_v17 = vsel %vm1945_vm0, %v1933_v31, %v2831_v22  ;;  %v1947_v38 = vsel %vm1945_vm0, %v1934_v15, %v2832_v26 }
 0x356   : > { %v2835_v29 = vpop.permute.xlu0 %2834  ;;  %v2845_v40 = vpop.permute.xlu1 %2844 }
 0x357   : > { %v2837_v41 = vunpack.i.h.bf16 %v2835_v29  ;;  %v2836_v54 = vunpack.i.l.bf16 %v2835_v29  ;;  %v2847_v37 = vunpack.i.h.bf16 %v2845_v40  ;;  %v2846_v27 = vunpack.i.l.bf16 %v2845_v40 }
 0x359   : > { %v1959_v36 = vsel %vm1958_vm1, %v1946_v17, %v2836_v54  ;;  %v1960_v59 = vsel %vm1958_vm1, %v1947_v38, %v2837_v41 }
 0x35a   : > { %v1971_v49 = vpack.c.bf16 %v1960_v59, %v1959_v36  ;;  %v2850_v14 = vpop.permute.xlu1 %2849  ;;  %v2840_v57 = vpop.permute.xlu0 %2839 }
 0x35b   : > { %v2842_v51 = vunpack.i.h.bf16 %v2840_v57  ;;  %v2841_v62 = vunpack.i.l.bf16 %v2840_v57  ;;  %v2852_v21 = vunpack.i.h.bf16 %v2850_v14  ;;  %v2851_v48 = vunpack.i.l.bf16 %v2850_v14 }
 0x35c   : > { %2752 = vmatprep.mubr.msk.bf16.mxu0 %vm394_vm2, %v1971_v49 }
 0x35d   : > { %v1923_v5 = vsel %vm1919_vm14, %v3632_v13, %v2842_v51  ;;  %v1922_v12 = vsel %vm1919_vm14, %v3619_v25, %v2841_v62 }
 0x35e   : > { %v1936_v45 = vsel %vm1932_vm15, %v1923_v5, %v2847_v37  ;;  %v1935_v16 = vsel %vm1932_vm15, %v1922_v12, %v2846_v27  ;;  %v2855_v30 = vpop.permute.xlu1 %2854  ;;  %v2860_v32 = vpop.permute.xlu0 %2859 }
 0x35f   : > { %v2857_v7 = vunpack.i.h.bf16 %v2855_v30  ;;  %v2856_v34 = vunpack.i.l.bf16 %v2855_v30  ;;  %v1948_v61 = vsel %vm1945_vm0, %v1935_v16, %v2851_v48  ;;  %v1949_v9 = vsel %vm1945_vm0, %v1936_v45, %v2852_v21 }
 0x360   : > { %v2862_v25 = vunpack.i.h.bf16 %v2860_v32  ;;  %v2861_v2 = vunpack.i.l.bf16 %v2860_v32 }
 0x361   : > { %v1961_v43 = vsel %vm1958_vm1, %v1948_v61, %v2856_v34  ;;  %v1962_v42 = vsel %vm1958_vm1, %v1949_v9, %v2857_v7 }
 0x362   : > { %v1972_v13 = vpack.c.bf16 %v1962_v42, %v1961_v43  ;;  %v2865_v8 = vpop.permute.xlu0 %2864  ;;  %v1925_v55 = vsel %vm1919_vm14, %v3670_v47, %v2862_v25  ;;  %v1924_v63 = vsel %vm1919_vm14, %v3652_v0, %v2861_v2 }
 0x363   : > { %v2867_v23 = vunpack.i.h.bf16 %v2865_v8  ;;  %v2866_v60 = vunpack.i.l.bf16 %v2865_v8 }
 0x364   : > { %2753 = vmatmul.mubr.msk.bf16.vlgmr.msra.gmra.mrb[84].mxu0 %vm394_vm2, %v1972_v13 }
 0x365   : > { %v1937_v18 = vsel %vm1932_vm15, %v1924_v63, %v2866_v60  ;;  %v1938_v58 = vsel %vm1932_vm15, %v1925_v55, %v2867_v23 }
 0x366   : > { %v2870_v28 = vpop.permute.xlu0 %2869  ;;  %v2880_v4 = vpop.permute.xlu1 %2879 }
 0x367   : > { %v2872_v11 = vunpack.i.h.bf16 %v2870_v28  ;;  %v2871_v56 = vunpack.i.l.bf16 %v2870_v28  ;;  %v2882_v47 = vunpack.i.h.bf16 %v2880_v4  ;;  %v2881_v26 = vunpack.i.l.bf16 %v2880_v4 }
 0x369   : > { %v1950_v39 = vsel %vm1945_vm0, %v1937_v18, %v2871_v56  ;;  %v1951_v52 = vsel %vm1945_vm0, %v1938_v58, %v2872_v11  ;;  %v1927_v54 = vsel %vm1919_vm14, %v3713_v46, %v2882_v47  ;;  %v1926_v17 = vsel %vm1919_vm14, %v3695_v50, %v2881_v26  ;;  %v3882_v26 = vld [vmem:[%s4008_s5] sm:$0xff] }
 0x36a   : > { %v2875_v24 = vpop.permute.xlu0 %2874  ;;  %v2885_v19 = vpop.permute.xlu1 %2884 }
 0x36b   : > { %v2877_v6 = vunpack.i.h.bf16 %v2875_v24  ;;  %v2876_v20 = vunpack.i.l.bf16 %v2875_v24  ;;  %v2887_v40 = vunpack.i.h.bf16 %v2885_v19  ;;  %v2886_v31 = vunpack.i.l.bf16 %v2885_v19 }
 0x36d   : > { %v1963_v10 = vsel %vm1958_vm1, %v1950_v39, %v2876_v20  ;;  %v1964_v53 = vsel %vm1958_vm1, %v1951_v52, %v2877_v6  ;;  %v1939_v59 = vsel %vm1932_vm15, %v1926_v17, %v2886_v31  ;;  %v1940_v49 = vsel %vm1932_vm15, %v1927_v54, %v2887_v40 }
 0x36e   : > { %v1973_v22 = vpack.c.bf16 %v1964_v53, %v1963_v10  ;;  %v2890_v0 = vpop.permute.xlu1 %2889  ;;  %v2900_v29 = vpop.permute.xlu0 %2899 }
 0x36f   : > { %v2892_v15 = vunpack.i.h.bf16 %v2890_v0  ;;  %v2891_v41 = vunpack.i.l.bf16 %v2890_v0  ;;  %v2902_v46 = vunpack.i.h.bf16 %v2900_v29  ;;  %v2901_v21 = vunpack.i.l.bf16 %v2900_v29 }
 0x370   : > { %2756 = vmatprep.mubr.msk.bf16.mxu0 %vm394_vm2, %v1973_v22 }
 0x371   : > { %v1952_v51 = vsel %vm1945_vm0, %v1939_v59, %v2891_v41  ;;  %v1953_v62 = vsel %vm1945_vm0, %v1940_v49, %v2892_v15  ;;  %v1929_v32 = vsel %vm1919_vm14, %v3742_v1, %v2902_v46  ;;  %v1928_v7 = vsel %vm1919_vm14, %v3725_v35, %v2901_v21 }
 0x372   : > { %v2895_v38 = vpop.permute.xlu1 %2894  ;;  %v2905_v36 = vpop.permute.xlu0 %2904 }
 0x373   : > { %v2897_v14 = vunpack.i.h.bf16 %v2895_v38  ;;  %v2896_v57 = vunpack.i.l.bf16 %v2895_v38  ;;  %v2907_v12 = vunpack.i.h.bf16 %v2905_v36  ;;  %v2906_v45 = vunpack.i.l.bf16 %v2905_v36 }
 0x375   : > { %v1965_v37 = vsel %vm1958_vm1, %v1952_v51, %v2896_v57  ;;  %v1966_v27 = vsel %vm1958_vm1, %v1953_v62, %v2897_v14  ;;  %v1941_v9 = vsel %vm1932_vm15, %v1928_v7, %v2906_v45  ;;  %v1942_v43 = vsel %vm1932_vm15, %v1929_v32, %v2907_v12  ;;  %v2175_v57 = vld [vmem:[%s4007_s4] sm:$0xff]  ;;  %v2176_v51 = vld [vmem:[%s4007_s4 + $0x8] sm:$0xff] }
 0x376   : > { %v1974_v48 = vpack.c.bf16 %v1966_v27, %v1965_v37  ;;  %v2910_v50 = vpop.permute.xlu0 %2909  ;;  %v2920_v5 = vpop.permute.xlu1 %2919  ;;  %v2177_v27 = vld [vmem:[%s4007_s4 + $0x10] sm:$0xff] }
 0x377   : > { %v2912_v16 = vunpack.i.h.bf16 %v2910_v50  ;;  %v2911_v30 = vunpack.i.l.bf16 %v2910_v50  ;;  %v2922_v1 = vunpack.i.h.bf16 %v2920_v5  ;;  %v2921_v4 = vunpack.i.l.bf16 %v2920_v5  ;;  %v2178_v50 = vld [vmem:[%s4007_s4 + $0x18] sm:$0xff] }
 0x378   : > { %2757 = vmatmul.mubr.msk.bf16.gmra.mrb[88].mxu0 %vm394_vm2, %v1974_v48 }
 0x379   : > { %v1954_v8 = vsel %vm1945_vm0, %v1941_v9, %v2911_v30  ;;  %v1955_v25 = vsel %vm1945_vm0, %v1942_v43, %v2912_v16  ;;  %v1931_v63 = vsel %vm1919_vm14, %v3764_v3, %v2922_v1  ;;  %v1930_v24 = vsel %vm1919_vm14, %v3758_v33, %v2921_v4 }
 0x37a   : > { %v2915_v34 = vpop.permute.xlu0 %2914  ;;  %v2925_v61 = vpop.permute.xlu1 %2924  ;;  %v2133_v33 = vsub.s32 3, %v3247_v44  ;;  %v2149_v3 = vsub.s32 4, %v3247_v44 }
 0x37b   : > { %v2917_v42 = vunpack.i.h.bf16 %v2915_v34  ;;  %v2916_v13 = vunpack.i.l.bf16 %v2915_v34  ;;  %v2927_v60 = vunpack.i.h.bf16 %v2925_v61  ;;  %v2926_v11 = vunpack.i.l.bf16 %v2925_v61 }
 0x37c   : > { %v3885_v22 = vrot.slane %v3882_v26, %v2133_v33  ;;  %v3888_v29 = vrot.slane %v3882_v26, %v2149_v3 }
 0x37d   : > { %v1967_v2 = vsel %vm1958_vm1, %v1954_v8, %v2916_v13  ;;  %v1968_v28 = vsel %vm1958_vm1, %v1955_v25, %v2917_v42  ;;  %v1943_v18 = vsel %vm1932_vm15, %v1930_v24, %v2926_v11  ;;  %v1944_v58 = vsel %vm1932_vm15, %v1931_v63, %v2927_v60 }
 0x37e   : > { %v1975_v23 = vpack.c.bf16 %v1968_v28, %v1967_v2  ;;  %v2930_v35 = vpop.permute.xlu1 %2929  ;;  %v2179_v2 = vld [vmem:[%s4007_s4 + $0x20] sm:$0xff] }
 0x37f   : > { %v2932_v56 = vunpack.i.h.bf16 %v2930_v35  ;;  %v2931_v55 = vunpack.i.l.bf16 %v2930_v35 }
 0x380   : > { %2760 = vmatprep.mubr.msk.bf16.mxu0 %vm394_vm2, %v1975_v23  ;;  %v2180_v23 = vld [vmem:[%s4007_s4 + $0x28] sm:$0xff] }
 0x381   : > { %v1957_v39 = vsel %vm1945_vm0, %v1944_v58, %v2932_v56  ;;  %v1956_v52 = vsel %vm1945_vm0, %v1943_v18, %v2931_v55  ;;  %v2181_v56 = vld [vmem:[%s4007_s4 + $0x30] sm:$0xff] }
 0x382   : > { %v2935_v19 = vpop.permute.xlu1 %2934 }
 0x383   : > { %v2937_v6 = vunpack.i.h.bf16 %v2935_v19  ;;  %v2936_v20 = vunpack.i.l.bf16 %v2935_v19  ;;  %v2182_v19 = vld [vmem:[%s4007_s4 + $0x38] sm:$0xff] }
 0x385   : > { %v1969_v10 = vsel %vm1958_vm1, %v1956_v52, %v2936_v20  ;;  %v1970_v53 = vsel %vm1958_vm1, %v1957_v39, %v2937_v6 }
 0x386   : > { %v1976_v47 = vpack.c.bf16 %v1970_v53, %v1969_v10 }
 0x388   : > { %2761 = vmatmul.mubr.msk.bf16.gmra.mrb[92].mxu0 %vm394_vm2, %v1976_v47  ;;  %vm2239_vm2 = vcmask 7168  }
 0x437   : > { %v2754_v0 = vpop.f32.mrb[84].mxu0 }
 0x438   : > { %v2137_v40 = vmul.f32 %v2754_v0, %v3885_v22  ;;  %v2084_v31 = vpop.f32.mrb[85].mxu0 }
 0x439   : > { %v2135_v15 = vmul.f32 %v3885_v22, %v2084_v31  ;;  %v2755_v41 = vpop.f32.mrb[86].mxu0 }
 0x43a   : > { %v2138_v44 = vmul.f32 %v2755_v41, %v3885_v22  ;;  %v2087_v54 = vpop.f32.mrb[87].mxu0  ;;  %v2153_v17 = vadd.f32 %v3888_v29, %v2137_v40  ;;  %v2183_v41 = vld [vmem:[%s4007_s4 + $0x40] sm:$0xff] }
 0x43b   : > { %v2151_v38 = vadd.f32 %v3888_v29, %v2135_v15  ;;  %v2136_v36 = vmul.f32 %v3885_v22, %v2087_v54 }
 0x43c   : > { %v2154_v49 = vadd.f32 %v3888_v29, %v2138_v44  ;;  %v2165_v62 = vmax.f32 %v2153_v17, 0.0 }
 0x43d   : > { %v2163_v59 = vmax.f32 %v2151_v38, 0.0  ;;  %v2152_v14 = vadd.f32 %v3888_v29, %v2136_v36  ;;  %v2184_v36 = vld [vmem:[%s4007_s4 + $0x48] sm:$0xff] }
 0x43e   : > { %v2166_v21 = vmax.f32 %v2154_v49, 0.0  ;;  %v2189_v5 = vmul.f32 %v2177_v27, %v2165_v62 }
 0x43f   : > { %v2164_v37 = vmax.f32 %v2152_v14, 0.0  ;;  %v2187_v46 = vmul.f32 %v2175_v57, %v2163_v59  ;;  %v2185_v57 = vld [vmem:[%s4007_s4 + $0x50] sm:$0xff] }
 0x440   : > { %v2190_v45 = vmul.f32 %v2178_v50, %v2166_v21 }
 0x441   : > { %v2188_v48 = vmul.f32 %v2176_v51, %v2164_v37 }
 0x443   : > { %v2199_v12 = vadd.f32 %v2188_v48, %v2187_v46 }
 0x445   : > { %v2200_v16 = vadd.f32 %v2199_v12, %v2189_v5 }
 0x447   : > { %v2201_v30 = vadd.f32 %v2200_v16, %v2190_v45 }
 0x44b   : > { %v2758_v32 = vpop.f32.mrb[88].mxu0 }
 0x44c   : > { %v2141_v7 = vmul.f32 %v2758_v32, %v3885_v22  ;;  %v2100_v34 = vpop.f32.mrb[89].mxu0 }
 0x44d   : > { %v2139_v61 = vmul.f32 %v3885_v22, %v2100_v34  ;;  %v2759_v9 = vpop.f32.mrb[90].mxu0 }
 0x44e   : > { %v2142_v43 = vmul.f32 %v2759_v9, %v3885_v22  ;;  %v2103_v42 = vpop.f32.mrb[91].mxu0  ;;  %v2157_v13 = vadd.f32 %v3888_v29, %v2141_v7 }
 0x44f   : > { %v2155_v8 = vadd.f32 %v3888_v29, %v2139_v61  ;;  %v2140_v25 = vmul.f32 %v3885_v22, %v2103_v42 }
 0x450   : > { %v2158_v1 = vadd.f32 %v3888_v29, %v2142_v43  ;;  %v2169_v35 = vmax.f32 %v2157_v13, 0.0 }
 0x451   : > { %v2167_v28 = vmax.f32 %v2155_v8, 0.0  ;;  %v2156_v4 = vadd.f32 %v3888_v29, %v2140_v25  ;;  %v2246_v25 = vrot.slane %v3882_v26, 5 }
 0x452   : > { %v2170_v63 = vmax.f32 %v2158_v1, 0.0  ;;  %v2193_v18 = vmul.f32 %v2181_v56, %v2169_v35 }
 0x453   : > { %v2191_v60 = vmul.f32 %v2179_v2, %v2167_v28  ;;  %v2168_v11 = vmax.f32 %v2156_v4, 0.0 }
 0x454   : > { %v2194_v6 = vmul.f32 %v2182_v19, %v2170_v63 }
 0x455   : > { %v2202_v55 = vadd.f32 %v2201_v30, %v2191_v60  ;;  %v2192_v24 = vmul.f32 %v2180_v23, %v2168_v11 }
 0x457   : > { %v2203_v58 = vadd.f32 %v2202_v55, %v2192_v24 }
 0x459   : > { %v2204_v20 = vadd.f32 %v2203_v58, %v2193_v18 }
 0x45b   : > { %v2762_v39 = vpop.f32.mrb[92].mxu0  ;;  %v2205_v52 = vadd.f32 %v2204_v20, %v2194_v6 }
 0x45c   : > { %v2145_v10 = vmul.f32 %v2762_v39, %v3885_v22  ;;  %v2116_v53 = vpop.f32.mrb[93].mxu0 }
 0x45d   : > { %v2143_v47 = vmul.f32 %v3885_v22, %v2116_v53  ;;  %v2763_v33 = vpop.f32.mrb[94].mxu0 }
 0x45e   : > { %v2146_v3 = vmul.f32 %v2763_v33, %v3885_v22  ;;  %v2119_v0 = vpop.f32.mrb[95].mxu0  ;;  %v2161_v40 = vadd.f32 %v3888_v29, %v2145_v10 }
 0x45f   : > { %v2159_v31 = vadd.f32 %v3888_v29, %v2143_v47  ;;  %v2144_v15 = vmul.f32 %v3885_v22, %v2119_v0  ;;  %v2186_v22 = vld [vmem:[%s4007_s4 + $0x58] sm:$0x3f] }
 0x460   : > { %v2162_v44 = vadd.f32 %v3888_v29, %v2146_v3  ;;  %v2173_v59 = vmax.f32 %v2161_v40, 0.0 }
 0x461   : > { %v2171_v54 = vmax.f32 %v2159_v31, 0.0  ;;  %v2160_v17 = vadd.f32 %v3888_v29, %v2144_v15 }
 0x462   : > { %v2174_v38 = vmax.f32 %v2162_v44, 0.0  ;;  %v2197_v29 = vmul.f32 %v2185_v57, %v2173_v59 }
 0x463   : > { %v2195_v49 = vmul.f32 %v2183_v41, %v2171_v54  ;;  %v2172_v14 = vmax.f32 %v2160_v17, 0.0 }
 0x464   : > { %v2198_v37 = vmul.f32 %v2186_v22, %v2174_v38 }
 0x465   : > { %v2206_v51 = vadd.f32 %v2205_v52, %v2195_v49  ;;  %v2196_v62 = vmul.f32 %v2184_v36, %v2172_v14 }
 0x466   : > { %v2209_v21 = vsel %vm1406_vm9, %v2198_v37, 0.0 }
 0x467   : > { %v2207_v27 = vadd.f32 %v2206_v51, %v2196_v62 }
 0x469   : > { %v2208_v46 = vadd.f32 %v2207_v27, %v2197_v29 }
 0x46b   : > { %v2210_v48 = vadd.f32 %v2209_v21, %v2208_v46 }
 0x46d   : > { %v2211_v50 = vrot.slane %v2210_v48, 4 }
 0x46f   : > { %v2212_v5 = vadd.f32 %v2211_v50, %v2210_v48 }
 0x471   : > { %v2213_v12 = vrot.slane %v2212_v5, 2 }
 0x473   : > { %v2214_v45 = vadd.f32 %v2213_v12, %v2212_v5 }
 0x475   : > { %v2215_v16 = vrot.slane %v2214_v45, 1 }
 0x477   : > { %v2216_v30 = vadd.f32 %v2215_v16, %v2214_v45 }
 0x479   : > { %2227 = vrot.lane.b32.xlu1 %v2216_v30, %s3046_s19  ;;  %2221 = vrot.lane.b32.xlu0 %v2216_v30, %s3047_s20  ;;  %v2217_v32 = vsel %vm850_vm5, %v2216_v30, 0.0 }
 0x47d   : > { %2233 = vrot.lane.b32.xlu0 %v2216_v30, %s3048_s26 }
 0x49d   : > { %2218 = vadd.xlane.f32.xlu1 %v2217_v32 }
 0x4eb   : > { %v2222_v7 = vpop.permute.xlu0 %2221  ;;  %v2228_v61 = vpop.permute.xlu1 %2227 }
 0x4ec   : > { %v2224_v34 = vsel %vm850_vm5, %v2222_v7, 0.0  ;;  %v2230_v43 = vsel %vm850_vm5, %v2228_v61, 0.0 }
 0x4ed   : > { %2225 = vadd.xlane.f32.xlu0 %v2224_v34 }
 0x4ef   : > { %v2234_v9 = vpop.permute.xlu0 %2233 }
 0x4f0   : > { %v2236_v42 = vsel %vm850_vm5, %v2234_v9, 0.0  ;;  %vm2249_vm5 = vcmask 24576  }
 0x4f1   : > { %2231 = vadd.xlane.f32.xlu0 %v2230_v43  ;;  %2237 = vadd.xlane.f32.xlu1 %v2236_v42 }
 0x52a   : > { %v2219_v13 = vpop.xlane.xlu1 %2218 }
 0x57a   : > { %v2226_v8 = vpop.xlane.xlu0 %2225 }
 0x57b   : > { %v2240_v2 = vsel %vm2239_vm2, %v2219_v13, %v2226_v8 }
 0x57e   : > { %v2232_v28 = vpop.xlane.xlu0 %2231  ;;  %v2238_v1 = vpop.xlane.xlu1 %2237 }
 0x57f   : > { %v2242_v4 = vsel %vm2241_vm3, %v2240_v2, %v2232_v28 }
 0x580   : > { %v2244_v23 = vsel %vm2243_vm4, %v2242_v4, %v2238_v1 }
 0x581   : > { %v2248_v35 = vadd.f32 %v2246_v25, %v2244_v23 }
 0x583   : > { %2250 = vst.msk [vmem:[%s243_s9] sm:$0x1] %vm2249_vm5, %v2248_v35 }
 0x584   : > { %2989 = shalt.err (!%p2986_p3)
}
 0x585   : > { %s2990_s18 = scalar_lea.hbm %s3961_s13, 16  ;;  %s2994_s26 = scalar_lea.hbm %s4009_s6, 32 }
 0x586   : > { %p2991_p4 = scmp.ne.s32.totalorder %s3961_s13, %s2990_s18  ;;  %p2995_p9 = scmp.lt.u32.totalorder %s3961_s13, %s4009_s6 }
 0x587   : > { %p2996_p10 = scmp.lt.u32.totalorder %s2994_s26, %s2990_s18  ;;  %p2998_p12 = scmp.lt.u32.totalorder %s2990_s18, %s3961_s13 }
 0x588   : > { %p2992_p7 = pnand %p2991_p4, %p3123_p5 }
 0x589   : > { %p2997_p11 = por %p2996_p10, %p2995_p9 }
 0x58a   : > { %p2993_p8 = pneg %p2992_p7 }
 0x58b   : > { %p2999_p13 = por %p2998_p12, %p2997_p11 }
 0x58d   : > { %p3000_p0 = pnand %p2999_p13, %p2993_p8 }
 0x58f   : > { %3003 = shalt.err (!%p3000_p0)
}
 0x590   : > { %2770 = dma.vmem_to_hbm [thread:$0]  (%p3123_p5), %s3963_s10, 16, %s3961_s13, %s2252_s14  }
 0x591 PF: > { %p2776_p1 = scmp.ge.s32.totalorder %s3038_s24, 2  ;;  %s2276_s9 = sand.u32 1, %s3026_s21  }
 0x592   : > { %s2277_s11 = scalar_lea.sflag [#allocation3], %s2276_s9 }
 0x593   : > { %p2773_p2 = pnand %p2776_p1, %p3127_p6 }
 0x595   : > { %3021 = dma.done.wait (!%p2773_p2), %s2277_s11, 16  }
 0x596   : > { %3023 = vsyncadd (!%p2773_p2), %s2277_s11, 4294967280  ;;  %p16_p3 = scmp.ge.s32.totalorder %s3110_s27, 4   ;;  %s4012_s21 = smov %s3030_s22 }
 0x597   : > { %s4013_s22 = smov %s3034_s23  ;;  %s4014_s23 = smov %s3121_s30 }
 0x598   : > { %s4015_s24 = smov %s3110_s27  ;;  %18 = sbr.rel (!%p16_p3) target bundleno = 3 (0x3), region = 83 }
 0x59f   :  { %2281 = vsyncpa [#allocation3], 1 }
 0x5a0   :  { %2283 = vsyncpa [#allocation3 + $0x1], 1 }

</bundles_post_ra>
